<compile_context>
chip_gen: v7x
topology: tpu7x:2x2x1
jax: 0.10.0
libtpu: 0.0.40
codegen_flags: <defaults>
</compile_context>

<pallas_src>
import functools
import math

import jax
import jax.numpy as jnp
from jax.experimental import pallas as pl
from jax.experimental.pallas import tpu as pltpu


def _attention_kernel(x_ref, wqkv_ref, bqkv_ref, wo_ref, bo_ref, gamma_ref,
                      beta_ref, o_ref, ctx_ref, *, num_heads, head_dim, eps,
                      block_b, mm_dtype, exp_dtype):
    T = x_ref.shape[1]
    D = x_ref.shape[2]
    H = num_heads
    dk = head_dim
    scale = 1.0 / math.sqrt(dk)
    inv_d = 1.0 / D

    # Grid-invariant operands are whole-array VMEM residents (see BlockSpecs).
    # Weights are already in mm_dtype (pre-cast in the wrapper) -> no per-step cast.
    wqkv = wqkv_ref[...]                             # (D, 3D)  mm_dtype
    wo = wo_ref[...]                                 # (D, D)   mm_dtype
    bqkv = bqkv_ref[...].astype(jnp.float32)         # (1, 3D)
    bo = bo_ref[...].astype(jnp.float32)             # (1, D)
    gamma = gamma_ref[...].astype(jnp.float32)       # (1, D)
    beta = beta_ref[...].astype(jnp.float32)         # (1, D)

    def body(b, carry):
        x_row = x_ref[b]                             # (T, D) single VMEM load
        x_mm = x_row.astype(mm_dtype)

        # --- fused Q|K|V projection: one (T, D) x (D, 3D) MXU matmul ---
        qkv = jnp.dot(x_mm, wqkv,
                      preferred_element_type=jnp.float32) + bqkv    # (T, 3D) f32

        # --- per-head attention; head results land in the (T, D) ctx scratch ---
        for h in range(H):                           # static: static lane slices
            lo = h * dk
            q_h = (qkv[:, lo:lo + dk] * scale).astype(mm_dtype)     # scale folded into q
            k_h = qkv[:, D + lo:D + lo + dk].astype(mm_dtype)
            v_h = qkv[:, 2 * D + lo:2 * D + lo + dk].astype(mm_dtype)

            # q @ k^T via dot_general contracting last dims (no XLU transpose).
            s = jax.lax.dot_general(
                q_h, k_h, (((1,), (1,)), ((), ())),
                preferred_element_type=jnp.float32)                 # (T, T)

            # Softmax with deferred normalization (normalize after PV matmul).
            m = jnp.max(s, axis=-1, keepdims=True)
            e = jnp.exp((s - m).astype(exp_dtype))                  # (T, T)
            l = jnp.sum(e.astype(jnp.float32), axis=-1, keepdims=True)  # f32 row sum
            inv_l = pl.reciprocal(l, approx=True)                   # EUP slot
            inv_l = inv_l * (2.0 - l * inv_l)                       # Newton -> ~f32

            pv = jnp.dot(e.astype(mm_dtype), v_h,
                         preferred_element_type=jnp.float32)        # (T, dk)
            ctx_ref[:, lo:lo + dk] = pv * inv_l                     # f32 scratch

        # --- single full-width output projection: (T, D) x (D, D) ---
        out = jnp.dot(ctx_ref[...].astype(mm_dtype), wo,
                      preferred_element_type=jnp.float32) + bo      # (T, D)

        # --- residual + LayerNorm (two-pass statistics, f32) ---
        res = x_row.astype(jnp.float32) + out
        mean = jnp.sum(res, axis=-1, keepdims=True) * inv_d
        cen = res - mean
        var = jnp.sum(cen * cen, axis=-1, keepdims=True) * inv_d
        y = cen * jax.lax.rsqrt(var + eps)
        o_ref[b] = (y * gamma + beta).astype(o_ref.dtype)
        return carry

    jax.lax.fori_loop(0, block_b, body, 0, unroll=True)


def _vmem_bytes_estimate(block_b, T, D, x_itemsize, mm_itemsize):
    """Rough per-step VMEM footprint (double-buffered I/O + pinned weights + temps)."""
    io = 2 * 2 * block_b * T * D * x_itemsize                   # x + out, double buffered
    weights = 4 * D * D * mm_itemsize + 6 * D * 4               # wqkv+wo, biases/LN f32
    scratch = T * D * 4                                         # ctx scratch
    temps = T * 3 * D * 4 + T * T * 4 + 3 * T * D * 4           # qkv, scores, res/out
    return io + weights + scratch + temps


def _vmem_limit_bytes():
    try:
        cap = pltpu.get_tpu_info().vmem_capacity_bytes           # 128 MiB v5e/v6e, 64 MiB v7x
    except Exception:
        cap = 64 * 1024 * 1024
    # Leave headroom for compiler temporaries; cap the scoped limit at 100 MiB.
    return max(32 * 1024 * 1024, min(int(0.75 * cap), 100 * 1024 * 1024))


def einsum_self_attention(x, params, num_heads, *, block_b=None,
                          matmul_dtype=jnp.float32, exp_dtype=None, eps=1e-5):
    """x: (B, T, D).  params: dict of weights (already transposed to (D_in, D_out)).

    matmul_dtype=jnp.bfloat16 feeds bf16 operands to the MXU (recommended on all
    generations; v5e also runs bf16 natively) while accumulation and softmax /
    LayerNorm statistics stay f32.  exp_dtype=jnp.bfloat16 additionally computes
    the softmax exponentials in bf16 (v6e/v7x only — v5e has no bf16 EUP).
    """
    B, T, D = x.shape
    assert D % num_heads == 0
    head_dim = D // num_heads
    if exp_dtype is None:
        exp_dtype = jnp.float32

    mm_itemsize = jnp.dtype(matmul_dtype).itemsize
    vmem_limit = _vmem_limit_bytes()

    if block_b is None:
        block_b = 1
        for c in sorted({c for c in range(1, min(B, 8) + 1) if B % c == 0},
                        reverse=True):
            grid_len = B // c
            if grid_len < 2 and B > 1:
                continue                               # keep >= 2 steps (v7x megacore)
            if _vmem_bytes_estimate(c, T, D, x.dtype.itemsize,
                                    mm_itemsize) <= vmem_limit // 2:
                block_b = c
                break
    assert B % block_b == 0
    grid = (B // block_b,)

    # Fuse q/k/v weights & biases once at trace time and pre-cast weights to the
    # MXU operand dtype: one contiguous weight transfer, no in-kernel weight casts.
    wqkv = jnp.concatenate([params["wq"], params["wk"], params["wv"]],
                           axis=1).astype(matmul_dtype)                 # (D, 3D)
    bqkv = jnp.concatenate([params["bq"], params["bk"], params["bv"]],
                           axis=1).astype(jnp.float32)                  # (1, 3D)
    wo = params["wo"].astype(matmul_dtype)                              # (D, D)

    x_spec = pl.BlockSpec((block_b, T, D), lambda i: (i, 0, 0))
    # Grid-invariant operands: whole array pinned in VMEM — no per-step DMA.
    vmem_full = pl.BlockSpec(memory_space=pltpu.MemorySpace.VMEM)

    kernel = functools.partial(
        _attention_kernel, num_heads=num_heads, head_dim=head_dim, eps=eps,
        block_b=block_b, mm_dtype=matmul_dtype, exp_dtype=exp_dtype)

    flops = B * (8 * T * D * D + 4 * T * T * D)
    transcendentals = B * (num_heads * T * T + num_heads * T + T)
    bytes_accessed = (2 * B * T * D * x.dtype.itemsize
                      + 4 * D * D * mm_itemsize + 6 * D * 4)

    return pl.pallas_call(
        kernel,
        out_shape=jax.ShapeDtypeStruct((B, T, D), x.dtype),
        grid=grid,
        in_specs=[x_spec, vmem_full, vmem_full, vmem_full, vmem_full,
                  vmem_full, vmem_full],
        out_specs=x_spec,
        scratch_shapes=[pltpu.VMEM((T, D), jnp.float32)],
        compiler_params=pltpu.CompilerParams(
            dimension_semantics=("parallel",),
            vmem_limit_bytes=vmem_limit),
        cost_estimate=pl.CostEstimate(flops=flops,
                                      transcendentals=transcendentals,
                                      bytes_accessed=bytes_accessed),
    )(x, wqkv, bqkv, wo, params["bo"], params["gamma"], params["beta"])


def _reference(x, params, num_heads):
    """Pure-JAX reference mirroring the PyTorch forward (eval mode)."""
    B, T, D = x.shape
    dk = D // num_heads
    q = (x @ params["wq"] + params["bq"]).reshape(B, T, num_heads, dk)
    k = (x @ params["wk"] + params["bk"]).reshape(B, T, num_heads, dk)
    v = (x @ params["wv"] + params["bv"]).reshape(B, T, num_heads, dk)
    scores = jnp.einsum("bthd,bshd->bhts", q, k) / math.sqrt(dk)
    attn = jax.nn.softmax(scores, axis=-1)
    out = jnp.einsum("bhts,bshd->bthd", attn, v).reshape(B, T, D)
    out = out @ params["wo"] + params["bo"]
    res = x + out
    mean = res.mean(-1, keepdims=True)
    var = ((res - mean) ** 2).mean(-1, keepdims=True)
    return (res - mean) / jnp.sqrt(var + 1e-5) * params["gamma"] + params["beta"]


if __name__ == "__main__":
    B, T, D, H = 4, 8, 32, 4

    key = jax.random.PRNGKey(0)
    keys = jax.random.split(key, 10)
    s = 1.0 / math.sqrt(D)

    # Deterministic synthetic parameters. Weights stored transposed: (D_in, D_out).
    params = {
        "wq": jax.random.uniform(keys[0], (D, D), jnp.float32, -s, s),
        "bq": jax.random.uniform(keys[1], (1, D), jnp.float32, -s, s),
        "wk": jax.random.uniform(keys[2], (D, D), jnp.float32, -s, s),
        "bk": jax.random.uniform(keys[3], (1, D), jnp.float32, -s, s),
        "wv": jax.random.uniform(keys[4], (D, D), jnp.float32, -s, s),
        "bv": jax.random.uniform(keys[5], (1, D), jnp.float32, -s, s),
        "wo": jax.random.uniform(keys[6], (D, D), jnp.float32, -s, s),
        "bo": jax.random.uniform(keys[7], (1, D), jnp.float32, -s, s),
        "gamma": jnp.ones((1, D), jnp.float32),
        "beta": jnp.zeros((1, D), jnp.float32),
    }

    x = jax.random.normal(keys[8], (B, T, D), jnp.float32)
    ref = _reference(x, params, num_heads=H)

    # f32 MXU operands (tight-accuracy path).
    out = einsum_self_attention(x, params, num_heads=H)
    out = jax.block_until_ready(out)
    assert jnp.allclose(out, ref, atol=2e-4, rtol=2e-4), "f32 kernel mismatch vs reference"

    # bf16 MXU operands + bf16 softmax exp, f32 accumulation (v6e/v7x fast path).
    out_bf16 = einsum_self_attention(x, params, num_heads=H,
                                     matmul_dtype=jnp.bfloat16,
                                     exp_dtype=jnp.bfloat16)
    out_bf16 = jax.block_until_ready(out_bf16)
    assert jnp.allclose(out_bf16, ref, atol=6e-2, rtol=6e-2), "bf16 kernel mismatch vs reference"

    print("KERNEL_OK")
</pallas_src>

<mosaic_0001>
module attributes {stable_mosaic.version = 11 : i64} {
  func.func @_attention_kernel(%arg0: i32, %arg1: memref<2x8x32xf32, #tpu.memory_space<vmem>>, %arg2: memref<32x96xf32, #tpu.memory_space<vmem>>, %arg3: memref<1x96xf32, #tpu.memory_space<vmem>>, %arg4: memref<32x32xf32, #tpu.memory_space<vmem>>, %arg5: memref<1x32xf32, #tpu.memory_space<vmem>>, %arg6: memref<1x32xf32, #tpu.memory_space<vmem>>, %arg7: memref<1x32xf32, #tpu.memory_space<vmem>>, %arg8: memref<2x8x32xf32, #tpu.memory_space<vmem>>, %arg9: memref<8x32xf32, #tpu.memory_space<vmem>>) attributes {dimension_semantics = [#tpu.dimension_semantics<parallel>], iteration_bounds = array<i64: 2>, scalar_prefetch = 0 : i64, scratch_operands = 1 : i64, tpu.core_type = #tpu.core_type<tc>, window_params = [{transform_indices = @transform_0, window_bounds = array<i64: 2, 8, 32>}, {pipeline_mode = #tpu.pipeline_mode<synchronous>, transform_indices = @transform_1, window_bounds = array<i64: 32, 96>}, {pipeline_mode = #tpu.pipeline_mode<synchronous>, transform_indices = @transform_2, window_bounds = array<i64: 1, 96>}, {pipeline_mode = #tpu.pipeline_mode<synchronous>, transform_indices = @transform_3, window_bounds = array<i64: 32, 32>}, {pipeline_mode = #tpu.pipeline_mode<synchronous>, transform_indices = @transform_4, window_bounds = array<i64: 1, 32>}, {pipeline_mode = #tpu.pipeline_mode<synchronous>, transform_indices = @transform_5, window_bounds = array<i64: 1, 32>}, {pipeline_mode = #tpu.pipeline_mode<synchronous>, transform_indices = @transform_6, window_bounds = array<i64: 1, 32>}, {transform_indices = @transform_7, window_bounds = array<i64: 2, 8, 32>}]} {
    %c0 = arith.constant 0 : index
    %c0_0 = arith.constant 0 : index
    %0 = vector.load %arg2[%c0, %c0_0] : memref<32x96xf32, #tpu.memory_space<vmem>>, vector<32x96xf32>
    %c0_1 = arith.constant 0 : index
    %c0_2 = arith.constant 0 : index
    %1 = vector.load %arg4[%c0_1, %c0_2] : memref<32x32xf32, #tpu.memory_space<vmem>>, vector<32x32xf32>
    %c0_3 = arith.constant 0 : index
    %c0_4 = arith.constant 0 : index
    %2 = vector.load %arg3[%c0_3, %c0_4] : memref<1x96xf32, #tpu.memory_space<vmem>>, vector<1x96xf32>
    %c0_5 = arith.constant 0 : index
    %c0_6 = arith.constant 0 : index
    %3 = vector.load %arg5[%c0_5, %c0_6] : memref<1x32xf32, #tpu.memory_space<vmem>>, vector<1x32xf32>
    %c0_7 = arith.constant 0 : index
    %c0_8 = arith.constant 0 : index
    %4 = vector.load %arg6[%c0_7, %c0_8] : memref<1x32xf32, #tpu.memory_space<vmem>>, vector<1x32xf32>
    %c0_9 = arith.constant 0 : index
    %c0_10 = arith.constant 0 : index
    %5 = vector.load %arg7[%c0_9, %c0_10] : memref<1x32xf32, #tpu.memory_space<vmem>>, vector<1x32xf32>
    %c0_i32 = arith.constant 0 : i32
    %6 = arith.index_cast %c0_i32 : i32 to index
    %c0_11 = arith.constant 0 : index
    %c0_12 = arith.constant 0 : index
    %7 = vector.load %arg1[%6, %c0_11, %c0_12] : memref<2x8x32xf32, #tpu.memory_space<vmem>>, vector<1x8x32xf32>
    %8 = vector.shape_cast %7 : vector<1x8x32xf32> to vector<8x32xf32>
    %cst = arith.constant dense<0.000000e+00> : vector<8x96xf32>
    %9 = tpu.matmul %8, %0, %cst {dimension_numbers = #tpu.dot_dimension_numbers<[1], [0], [0], [1], [0, 0, 1, 1], [], []>} : vector<8x32xf32>, vector<32x96xf32>, vector<8x96xf32> -> vector<8x96xf32>
    %10 = vector.broadcast %2 : vector<1x96xf32> to vector<8x96xf32>
    %11 = arith.addf %9, %10 : vector<8x96xf32>
    %12 = vector.extract_strided_slice %11 {offsets = [0, 0], sizes = [8, 8], strides = [1, 1]} : vector<8x96xf32> to vector<8x8xf32>
    %cst_13 = arith.constant 0.353553385 : f32
    %13 = vector.broadcast %cst_13 : f32 to vector<8x8xf32>
    %14 = arith.mulf %12, %13 : vector<8x8xf32>
    %15 = vector.extract_strided_slice %11 {offsets = [0, 32], sizes = [8, 8], strides = [1, 1]} : vector<8x96xf32> to vector<8x8xf32>
    %16 = vector.extract_strided_slice %11 {offsets = [0, 64], sizes = [8, 8], strides = [1, 1]} : vector<8x96xf32> to vector<8x8xf32>
    %cst_14 = arith.constant dense<0.000000e+00> : vector<8x8xf32>
    %17 = tpu.matmul %14, %15, %cst_14 {dimension_numbers = #tpu.dot_dimension_numbers<[1], [1], [0], [0], [0, 0, 1, 0], [], []>} : vector<8x8xf32>, vector<8x8xf32>, vector<8x8xf32> -> vector<8x8xf32>
    %cst_15 = arith.constant dense<0xFF800000> : vector<8xf32>
    %18 = vector.multi_reduction <maximumf>, %17, %cst_15 [1] : vector<8x8xf32> to vector<8xf32>
    %19 = vector.shape_cast %18 : vector<8xf32> to vector<8x1xf32>
    %20 = vector.broadcast %19 : vector<8x1xf32> to vector<8x8xf32>
    %21 = arith.subf %17, %20 : vector<8x8xf32>
    %22 = math.exp %21 : vector<8x8xf32>
    %cst_16 = arith.constant dense<0.000000e+00> : vector<8xf32>
    %23 = vector.multi_reduction <add>, %22, %cst_16 [1] : vector<8x8xf32> to vector<8xf32>
    %24 = vector.shape_cast %23 : vector<8xf32> to vector<8x1xf32>
    %25 = tpu.reciprocal %24 {approx = true} : vector<8x1xf32> -> vector<8x1xf32>
    %26 = arith.mulf %24, %25 : vector<8x1xf32>
    %cst_17 = arith.constant 2.000000e+00 : f32
    %27 = vector.broadcast %cst_17 : f32 to vector<8x1xf32>
    %28 = arith.subf %27, %26 : vector<8x1xf32>
    %29 = arith.mulf %25, %28 : vector<8x1xf32>
    %cst_18 = arith.constant dense<0.000000e+00> : vector<8x8xf32>
    %30 = tpu.matmul %22, %16, %cst_18 {dimension_numbers = #tpu.dot_dimension_numbers<[1], [0], [0], [1], [0, 0, 1, 1], [], []>} : vector<8x8xf32>, vector<8x8xf32>, vector<8x8xf32> -> vector<8x8xf32>
    %31 = vector.broadcast %29 : vector<8x1xf32> to vector<8x8xf32>
    %32 = arith.mulf %30, %31 : vector<8x8xf32>
    %c0_19 = arith.constant 0 : index
    %c0_20 = arith.constant 0 : index
    %33 = vector.load %arg9[%c0_19, %c0_20] : memref<8x32xf32, #tpu.memory_space<vmem>>, vector<8x8xf32>
    tpu.vector_store %arg9[%c0_19, %c0_20], %32 {strides = array<i32>} : memref<8x32xf32, #tpu.memory_space<vmem>>, vector<8x8xf32>,
    %34 = vector.extract_strided_slice %11 {offsets = [0, 8], sizes = [8, 8], strides = [1, 1]} : vector<8x96xf32> to vector<8x8xf32>
    %cst_21 = arith.constant 0.353553385 : f32
    %35 = vector.broadcast %cst_21 : f32 to vector<8x8xf32>
    %36 = arith.mulf %34, %35 : vector<8x8xf32>
    %37 = vector.extract_strided_slice %11 {offsets = [0, 40], sizes = [8, 8], strides = [1, 1]} : vector<8x96xf32> to vector<8x8xf32>
    %38 = vector.extract_strided_slice %11 {offsets = [0, 72], sizes = [8, 8], strides = [1, 1]} : vector<8x96xf32> to vector<8x8xf32>
    %cst_22 = arith.constant dense<0.000000e+00> : vector<8x8xf32>
    %39 = tpu.matmul %36, %37, %cst_22 {dimension_numbers = #tpu.dot_dimension_numbers<[1], [1], [0], [0], [0, 0, 1, 0], [], []>} : vector<8x8xf32>, vector<8x8xf32>, vector<8x8xf32> -> vector<8x8xf32>
    %cst_23 = arith.constant dense<0xFF800000> : vector<8xf32>
    %40 = vector.multi_reduction <maximumf>, %39, %cst_23 [1] : vector<8x8xf32> to vector<8xf32>
    %41 = vector.shape_cast %40 : vector<8xf32> to vector<8x1xf32>
    %42 = vector.broadcast %41 : vector<8x1xf32> to vector<8x8xf32>
    %43 = arith.subf %39, %42 : vector<8x8xf32>
    %44 = math.exp %43 : vector<8x8xf32>
    %cst_24 = arith.constant dense<0.000000e+00> : vector<8xf32>
    %45 = vector.multi_reduction <add>, %44, %cst_24 [1] : vector<8x8xf32> to vector<8xf32>
    %46 = vector.shape_cast %45 : vector<8xf32> to vector<8x1xf32>
    %47 = tpu.reciprocal %46 {approx = true} : vector<8x1xf32> -> vector<8x1xf32>
    %48 = arith.mulf %46, %47 : vector<8x1xf32>
    %cst_25 = arith.constant 2.000000e+00 : f32
    %49 = vector.broadcast %cst_25 : f32 to vector<8x1xf32>
    %50 = arith.subf %49, %48 : vector<8x1xf32>
    %51 = arith.mulf %47, %50 : vector<8x1xf32>
    %cst_26 = arith.constant dense<0.000000e+00> : vector<8x8xf32>
    %52 = tpu.matmul %44, %38, %cst_26 {dimension_numbers = #tpu.dot_dimension_numbers<[1], [0], [0], [1], [0, 0, 1, 1], [], []>} : vector<8x8xf32>, vector<8x8xf32>, vector<8x8xf32> -> vector<8x8xf32>
    %53 = vector.broadcast %51 : vector<8x1xf32> to vector<8x8xf32>
    %54 = arith.mulf %52, %53 : vector<8x8xf32>
    %c0_27 = arith.constant 0 : index
    %c8 = arith.constant 8 : index
    %55 = vector.load %arg9[%c0_27, %c8] : memref<8x32xf32, #tpu.memory_space<vmem>>, vector<8x8xf32>
    tpu.vector_store %arg9[%c0_27, %c8], %54 {strides = array<i32>} : memref<8x32xf32, #tpu.memory_space<vmem>>, vector<8x8xf32>,
    %56 = vector.extract_strided_slice %11 {offsets = [0, 16], sizes = [8, 8], strides = [1, 1]} : vector<8x96xf32> to vector<8x8xf32>
    %cst_28 = arith.constant 0.353553385 : f32
    %57 = vector.broadcast %cst_28 : f32 to vector<8x8xf32>
    %58 = arith.mulf %56, %57 : vector<8x8xf32>
    %59 = vector.extract_strided_slice %11 {offsets = [0, 48], sizes = [8, 8], strides = [1, 1]} : vector<8x96xf32> to vector<8x8xf32>
    %60 = vector.extract_strided_slice %11 {offsets = [0, 80], sizes = [8, 8], strides = [1, 1]} : vector<8x96xf32> to vector<8x8xf32>
    %cst_29 = arith.constant dense<0.000000e+00> : vector<8x8xf32>
    %61 = tpu.matmul %58, %59, %cst_29 {dimension_numbers = #tpu.dot_dimension_numbers<[1], [1], [0], [0], [0, 0, 1, 0], [], []>} : vector<8x8xf32>, vector<8x8xf32>, vector<8x8xf32> -> vector<8x8xf32>
    %cst_30 = arith.constant dense<0xFF800000> : vector<8xf32>
    %62 = vector.multi_reduction <maximumf>, %61, %cst_30 [1] : vector<8x8xf32> to vector<8xf32>
    %63 = vector.shape_cast %62 : vector<8xf32> to vector<8x1xf32>
    %64 = vector.broadcast %63 : vector<8x1xf32> to vector<8x8xf32>
    %65 = arith.subf %61, %64 : vector<8x8xf32>
    %66 = math.exp %65 : vector<8x8xf32>
    %cst_31 = arith.constant dense<0.000000e+00> : vector<8xf32>
    %67 = vector.multi_reduction <add>, %66, %cst_31 [1] : vector<8x8xf32> to vector<8xf32>
    %68 = vector.shape_cast %67 : vector<8xf32> to vector<8x1xf32>
    %69 = tpu.reciprocal %68 {approx = true} : vector<8x1xf32> -> vector<8x1xf32>
    %70 = arith.mulf %68, %69 : vector<8x1xf32>
    %cst_32 = arith.constant 2.000000e+00 : f32
    %71 = vector.broadcast %cst_32 : f32 to vector<8x1xf32>
    %72 = arith.subf %71, %70 : vector<8x1xf32>
    %73 = arith.mulf %69, %72 : vector<8x1xf32>
    %cst_33 = arith.constant dense<0.000000e+00> : vector<8x8xf32>
    %74 = tpu.matmul %66, %60, %cst_33 {dimension_numbers = #tpu.dot_dimension_numbers<[1], [0], [0], [1], [0, 0, 1, 1], [], []>} : vector<8x8xf32>, vector<8x8xf32>, vector<8x8xf32> -> vector<8x8xf32>
    %75 = vector.broadcast %73 : vector<8x1xf32> to vector<8x8xf32>
    %76 = arith.mulf %74, %75 : vector<8x8xf32>
    %c0_34 = arith.constant 0 : index
    %c16 = arith.constant 16 : index
    %77 = vector.load %arg9[%c0_34, %c16] : memref<8x32xf32, #tpu.memory_space<vmem>>, vector<8x8xf32>
    tpu.vector_store %arg9[%c0_34, %c16], %76 {strides = array<i32>} : memref<8x32xf32, #tpu.memory_space<vmem>>, vector<8x8xf32>,
    %78 = vector.extract_strided_slice %11 {offsets = [0, 24], sizes = [8, 8], strides = [1, 1]} : vector<8x96xf32> to vector<8x8xf32>
    %cst_35 = arith.constant 0.353553385 : f32
    %79 = vector.broadcast %cst_35 : f32 to vector<8x8xf32>
    %80 = arith.mulf %78, %79 : vector<8x8xf32>
    %81 = vector.extract_strided_slice %11 {offsets = [0, 56], sizes = [8, 8], strides = [1, 1]} : vector<8x96xf32> to vector<8x8xf32>
    %82 = vector.extract_strided_slice %11 {offsets = [0, 88], sizes = [8, 8], strides = [1, 1]} : vector<8x96xf32> to vector<8x8xf32>
    %cst_36 = arith.constant dense<0.000000e+00> : vector<8x8xf32>
    %83 = tpu.matmul %80, %81, %cst_36 {dimension_numbers = #tpu.dot_dimension_numbers<[1], [1], [0], [0], [0, 0, 1, 0], [], []>} : vector<8x8xf32>, vector<8x8xf32>, vector<8x8xf32> -> vector<8x8xf32>
    %cst_37 = arith.constant dense<0xFF800000> : vector<8xf32>
    %84 = vector.multi_reduction <maximumf>, %83, %cst_37 [1] : vector<8x8xf32> to vector<8xf32>
    %85 = vector.shape_cast %84 : vector<8xf32> to vector<8x1xf32>
    %86 = vector.broadcast %85 : vector<8x1xf32> to vector<8x8xf32>
    %87 = arith.subf %83, %86 : vector<8x8xf32>
    %88 = math.exp %87 : vector<8x8xf32>
    %cst_38 = arith.constant dense<0.000000e+00> : vector<8xf32>
    %89 = vector.multi_reduction <add>, %88, %cst_38 [1] : vector<8x8xf32> to vector<8xf32>
    %90 = vector.shape_cast %89 : vector<8xf32> to vector<8x1xf32>
    %91 = tpu.reciprocal %90 {approx = true} : vector<8x1xf32> -> vector<8x1xf32>
    %92 = arith.mulf %90, %91 : vector<8x1xf32>
    %cst_39 = arith.constant 2.000000e+00 : f32
    %93 = vector.broadcast %cst_39 : f32 to vector<8x1xf32>
    %94 = arith.subf %93, %92 : vector<8x1xf32>
    %95 = arith.mulf %91, %94 : vector<8x1xf32>
    %cst_40 = arith.constant dense<0.000000e+00> : vector<8x8xf32>
    %96 = tpu.matmul %88, %82, %cst_40 {dimension_numbers = #tpu.dot_dimension_numbers<[1], [0], [0], [1], [0, 0, 1, 1], [], []>} : vector<8x8xf32>, vector<8x8xf32>, vector<8x8xf32> -> vector<8x8xf32>
    %97 = vector.broadcast %95 : vector<8x1xf32> to vector<8x8xf32>
    %98 = arith.mulf %96, %97 : vector<8x8xf32>
    %c0_41 = arith.constant 0 : index
    %c24 = arith.constant 24 : index
    %99 = vector.load %arg9[%c0_41, %c24] : memref<8x32xf32, #tpu.memory_space<vmem>>, vector<8x8xf32>
    tpu.vector_store %arg9[%c0_41, %c24], %98 {strides = array<i32>} : memref<8x32xf32, #tpu.memory_space<vmem>>, vector<8x8xf32>,
    %c0_42 = arith.constant 0 : index
    %c0_43 = arith.constant 0 : index
    %100 = vector.load %arg9[%c0_42, %c0_43] : memref<8x32xf32, #tpu.memory_space<vmem>>, vector<8x32xf32>
    %cst_44 = arith.constant dense<0.000000e+00> : vector<8x32xf32>
    %101 = tpu.matmul %100, %1, %cst_44 {dimension_numbers = #tpu.dot_dimension_numbers<[1], [0], [0], [1], [0, 0, 1, 1], [], []>} : vector<8x32xf32>, vector<32x32xf32>, vector<8x32xf32> -> vector<8x32xf32>
    %102 = vector.broadcast %3 : vector<1x32xf32> to vector<8x32xf32>
    %103 = arith.addf %101, %102 : vector<8x32xf32>
    %104 = arith.addf %8, %103 : vector<8x32xf32>
    %cst_45 = arith.constant dense<0.000000e+00> : vector<8xf32>
    %105 = vector.multi_reduction <add>, %104, %cst_45 [1] : vector<8x32xf32> to vector<8xf32>
    %106 = vector.shape_cast %105 : vector<8xf32> to vector<8x1xf32>
    %cst_46 = arith.constant 3.125000e-02 : f32
    %107 = vector.broadcast %cst_46 : f32 to vector<8x1xf32>
    %108 = arith.mulf %106, %107 : vector<8x1xf32>
    %109 = vector.broadcast %108 : vector<8x1xf32> to vector<8x32xf32>
    %110 = arith.subf %104, %109 : vector<8x32xf32>
    %111 = arith.mulf %110, %110 : vector<8x32xf32>
    %cst_47 = arith.constant dense<0.000000e+00> : vector<8xf32>
    %112 = vector.multi_reduction <add>, %111, %cst_47 [1] : vector<8x32xf32> to vector<8xf32>
    %113 = vector.shape_cast %112 : vector<8xf32> to vector<8x1xf32>
    %cst_48 = arith.constant 3.125000e-02 : f32
    %114 = vector.broadcast %cst_48 : f32 to vector<8x1xf32>
    %115 = arith.mulf %113, %114 : vector<8x1xf32>
    %cst_49 = arith.constant 9.99999974E-6 : f32
    %116 = vector.broadcast %cst_49 : f32 to vector<8x1xf32>
    %117 = arith.addf %115, %116 : vector<8x1xf32>
    %118 = math.rsqrt %117 : vector<8x1xf32>
    %119 = vector.broadcast %118 : vector<8x1xf32> to vector<8x32xf32>
    %120 = arith.mulf %110, %119 : vector<8x32xf32>
    %121 = vector.broadcast %4 : vector<1x32xf32> to vector<8x32xf32>
    %122 = arith.mulf %120, %121 : vector<8x32xf32>
    %123 = vector.broadcast %5 : vector<1x32xf32> to vector<8x32xf32>
    %124 = arith.addf %122, %123 : vector<8x32xf32>
    %125 = arith.index_cast %c0_i32 : i32 to index
    %c0_50 = arith.constant 0 : index
    %c0_51 = arith.constant 0 : index
    %126 = vector.load %arg8[%125, %c0_50, %c0_51] : memref<2x8x32xf32, #tpu.memory_space<vmem>>, vector<1x8x32xf32>
    %127 = vector.shape_cast %126 : vector<1x8x32xf32> to vector<8x32xf32>
    %128 = vector.shape_cast %124 : vector<8x32xf32> to vector<1x8x32xf32>
    tpu.vector_store %arg8[%125, %c0_50, %c0_51], %128 {strides = array<i32>} : memref<2x8x32xf32, #tpu.memory_space<vmem>>, vector<1x8x32xf32>,
    %c1_i32 = arith.constant 1 : i32
    %129 = arith.index_cast %c1_i32 : i32 to index
    %c0_52 = arith.constant 0 : index
    %c0_53 = arith.constant 0 : index
    %130 = vector.load %arg1[%129, %c0_52, %c0_53] : memref<2x8x32xf32, #tpu.memory_space<vmem>>, vector<1x8x32xf32>
    %131 = vector.shape_cast %130 : vector<1x8x32xf32> to vector<8x32xf32>
    %cst_54 = arith.constant dense<0.000000e+00> : vector<8x96xf32>
    %132 = tpu.matmul %131, %0, %cst_54 {dimension_numbers = #tpu.dot_dimension_numbers<[1], [0], [0], [1], [0, 0, 1, 1], [], []>} : vector<8x32xf32>, vector<32x96xf32>, vector<8x96xf32> -> vector<8x96xf32>
    %133 = vector.broadcast %2 : vector<1x96xf32> to vector<8x96xf32>
    %134 = arith.addf %132, %133 : vector<8x96xf32>
    %135 = vector.extract_strided_slice %134 {offsets = [0, 0], sizes = [8, 8], strides = [1, 1]} : vector<8x96xf32> to vector<8x8xf32>
    %cst_55 = arith.constant 0.353553385 : f32
    %136 = vector.broadcast %cst_55 : f32 to vector<8x8xf32>
    %137 = arith.mulf %135, %136 : vector<8x8xf32>
    %138 = vector.extract_strided_slice %134 {offsets = [0, 32], sizes = [8, 8], strides = [1, 1]} : vector<8x96xf32> to vector<8x8xf32>
    %139 = vector.extract_strided_slice %134 {offsets = [0, 64], sizes = [8, 8], strides = [1, 1]} : vector<8x96xf32> to vector<8x8xf32>
    %cst_56 = arith.constant dense<0.000000e+00> : vector<8x8xf32>
    %140 = tpu.matmul %137, %138, %cst_56 {dimension_numbers = #tpu.dot_dimension_numbers<[1], [1], [0], [0], [0, 0, 1, 0], [], []>} : vector<8x8xf32>, vector<8x8xf32>, vector<8x8xf32> -> vector<8x8xf32>
    %cst_57 = arith.constant dense<0xFF800000> : vector<8xf32>
    %141 = vector.multi_reduction <maximumf>, %140, %cst_57 [1] : vector<8x8xf32> to vector<8xf32>
    %142 = vector.shape_cast %141 : vector<8xf32> to vector<8x1xf32>
    %143 = vector.broadcast %142 : vector<8x1xf32> to vector<8x8xf32>
    %144 = arith.subf %140, %143 : vector<8x8xf32>
    %145 = math.exp %144 : vector<8x8xf32>
    %cst_58 = arith.constant dense<0.000000e+00> : vector<8xf32>
    %146 = vector.multi_reduction <add>, %145, %cst_58 [1] : vector<8x8xf32> to vector<8xf32>
    %147 = vector.shape_cast %146 : vector<8xf32> to vector<8x1xf32>
    %148 = tpu.reciprocal %147 {approx = true} : vector<8x1xf32> -> vector<8x1xf32>
    %149 = arith.mulf %147, %148 : vector<8x1xf32>
    %cst_59 = arith.constant 2.000000e+00 : f32
    %150 = vector.broadcast %cst_59 : f32 to vector<8x1xf32>
    %151 = arith.subf %150, %149 : vector<8x1xf32>
    %152 = arith.mulf %148, %151 : vector<8x1xf32>
    %cst_60 = arith.constant dense<0.000000e+00> : vector<8x8xf32>
    %153 = tpu.matmul %145, %139, %cst_60 {dimension_numbers = #tpu.dot_dimension_numbers<[1], [0], [0], [1], [0, 0, 1, 1], [], []>} : vector<8x8xf32>, vector<8x8xf32>, vector<8x8xf32> -> vector<8x8xf32>
    %154 = vector.broadcast %152 : vector<8x1xf32> to vector<8x8xf32>
    %155 = arith.mulf %153, %154 : vector<8x8xf32>
    %c0_61 = arith.constant 0 : index
    %c0_62 = arith.constant 0 : index
    %156 = vector.load %arg9[%c0_61, %c0_62] : memref<8x32xf32, #tpu.memory_space<vmem>>, vector<8x8xf32>
    tpu.vector_store %arg9[%c0_61, %c0_62], %155 {strides = array<i32>} : memref<8x32xf32, #tpu.memory_space<vmem>>, vector<8x8xf32>,
    %157 = vector.extract_strided_slice %134 {offsets = [0, 8], sizes = [8, 8], strides = [1, 1]} : vector<8x96xf32> to vector<8x8xf32>
    %cst_63 = arith.constant 0.353553385 : f32
    %158 = vector.broadcast %cst_63 : f32 to vector<8x8xf32>
    %159 = arith.mulf %157, %158 : vector<8x8xf32>
    %160 = vector.extract_strided_slice %134 {offsets = [0, 40], sizes = [8, 8], strides = [1, 1]} : vector<8x96xf32> to vector<8x8xf32>
    %161 = vector.extract_strided_slice %134 {offsets = [0, 72], sizes = [8, 8], strides = [1, 1]} : vector<8x96xf32> to vector<8x8xf32>
    %cst_64 = arith.constant dense<0.000000e+00> : vector<8x8xf32>
    %162 = tpu.matmul %159, %160, %cst_64 {dimension_numbers = #tpu.dot_dimension_numbers<[1], [1], [0], [0], [0, 0, 1, 0], [], []>} : vector<8x8xf32>, vector<8x8xf32>, vector<8x8xf32> -> vector<8x8xf32>
    %cst_65 = arith.constant dense<0xFF800000> : vector<8xf32>
    %163 = vector.multi_reduction <maximumf>, %162, %cst_65 [1] : vector<8x8xf32> to vector<8xf32>
    %164 = vector.shape_cast %163 : vector<8xf32> to vector<8x1xf32>
    %165 = vector.broadcast %164 : vector<8x1xf32> to vector<8x8xf32>
    %166 = arith.subf %162, %165 : vector<8x8xf32>
    %167 = math.exp %166 : vector<8x8xf32>
    %cst_66 = arith.constant dense<0.000000e+00> : vector<8xf32>
    %168 = vector.multi_reduction <add>, %167, %cst_66 [1] : vector<8x8xf32> to vector<8xf32>
    %169 = vector.shape_cast %168 : vector<8xf32> to vector<8x1xf32>
    %170 = tpu.reciprocal %169 {approx = true} : vector<8x1xf32> -> vector<8x1xf32>
    %171 = arith.mulf %169, %170 : vector<8x1xf32>
    %cst_67 = arith.constant 2.000000e+00 : f32
    %172 = vector.broadcast %cst_67 : f32 to vector<8x1xf32>
    %173 = arith.subf %172, %171 : vector<8x1xf32>
    %174 = arith.mulf %170, %173 : vector<8x1xf32>
    %cst_68 = arith.constant dense<0.000000e+00> : vector<8x8xf32>
    %175 = tpu.matmul %167, %161, %cst_68 {dimension_numbers = #tpu.dot_dimension_numbers<[1], [0], [0], [1], [0, 0, 1, 1], [], []>} : vector<8x8xf32>, vector<8x8xf32>, vector<8x8xf32> -> vector<8x8xf32>
    %176 = vector.broadcast %174 : vector<8x1xf32> to vector<8x8xf32>
    %177 = arith.mulf %175, %176 : vector<8x8xf32>
    %c0_69 = arith.constant 0 : index
    %c8_70 = arith.constant 8 : index
    %178 = vector.load %arg9[%c0_69, %c8_70] : memref<8x32xf32, #tpu.memory_space<vmem>>, vector<8x8xf32>
    tpu.vector_store %arg9[%c0_69, %c8_70], %177 {strides = array<i32>} : memref<8x32xf32, #tpu.memory_space<vmem>>, vector<8x8xf32>,
    %179 = vector.extract_strided_slice %134 {offsets = [0, 16], sizes = [8, 8], strides = [1, 1]} : vector<8x96xf32> to vector<8x8xf32>
    %cst_71 = arith.constant 0.353553385 : f32
    %180 = vector.broadcast %cst_71 : f32 to vector<8x8xf32>
    %181 = arith.mulf %179, %180 : vector<8x8xf32>
    %182 = vector.extract_strided_slice %134 {offsets = [0, 48], sizes = [8, 8], strides = [1, 1]} : vector<8x96xf32> to vector<8x8xf32>
    %183 = vector.extract_strided_slice %134 {offsets = [0, 80], sizes = [8, 8], strides = [1, 1]} : vector<8x96xf32> to vector<8x8xf32>
    %cst_72 = arith.constant dense<0.000000e+00> : vector<8x8xf32>
    %184 = tpu.matmul %181, %182, %cst_72 {dimension_numbers = #tpu.dot_dimension_numbers<[1], [1], [0], [0], [0, 0, 1, 0], [], []>} : vector<8x8xf32>, vector<8x8xf32>, vector<8x8xf32> -> vector<8x8xf32>
    %cst_73 = arith.constant dense<0xFF800000> : vector<8xf32>
    %185 = vector.multi_reduction <maximumf>, %184, %cst_73 [1] : vector<8x8xf32> to vector<8xf32>
    %186 = vector.shape_cast %185 : vector<8xf32> to vector<8x1xf32>
    %187 = vector.broadcast %186 : vector<8x1xf32> to vector<8x8xf32>
    %188 = arith.subf %184, %187 : vector<8x8xf32>
    %189 = math.exp %188 : vector<8x8xf32>
    %cst_74 = arith.constant dense<0.000000e+00> : vector<8xf32>
    %190 = vector.multi_reduction <add>, %189, %cst_74 [1] : vector<8x8xf32> to vector<8xf32>
    %191 = vector.shape_cast %190 : vector<8xf32> to vector<8x1xf32>
    %192 = tpu.reciprocal %191 {approx = true} : vector<8x1xf32> -> vector<8x1xf32>
    %193 = arith.mulf %191, %192 : vector<8x1xf32>
    %cst_75 = arith.constant 2.000000e+00 : f32
    %194 = vector.broadcast %cst_75 : f32 to vector<8x1xf32>
    %195 = arith.subf %194, %193 : vector<8x1xf32>
    %196 = arith.mulf %192, %195 : vector<8x1xf32>
    %cst_76 = arith.constant dense<0.000000e+00> : vector<8x8xf32>
    %197 = tpu.matmul %189, %183, %cst_76 {dimension_numbers = #tpu.dot_dimension_numbers<[1], [0], [0], [1], [0, 0, 1, 1], [], []>} : vector<8x8xf32>, vector<8x8xf32>, vector<8x8xf32> -> vector<8x8xf32>
    %198 = vector.broadcast %196 : vector<8x1xf32> to vector<8x8xf32>
    %199 = arith.mulf %197, %198 : vector<8x8xf32>
    %c0_77 = arith.constant 0 : index
    %c16_78 = arith.constant 16 : index
    %200 = vector.load %arg9[%c0_77, %c16_78] : memref<8x32xf32, #tpu.memory_space<vmem>>, vector<8x8xf32>
    tpu.vector_store %arg9[%c0_77, %c16_78], %199 {strides = array<i32>} : memref<8x32xf32, #tpu.memory_space<vmem>>, vector<8x8xf32>,
    %201 = vector.extract_strided_slice %134 {offsets = [0, 24], sizes = [8, 8], strides = [1, 1]} : vector<8x96xf32> to vector<8x8xf32>
    %cst_79 = arith.constant 0.353553385 : f32
    %202 = vector.broadcast %cst_79 : f32 to vector<8x8xf32>
    %203 = arith.mulf %201, %202 : vector<8x8xf32>
    %204 = vector.extract_strided_slice %134 {offsets = [0, 56], sizes = [8, 8], strides = [1, 1]} : vector<8x96xf32> to vector<8x8xf32>
    %205 = vector.extract_strided_slice %134 {offsets = [0, 88], sizes = [8, 8], strides = [1, 1]} : vector<8x96xf32> to vector<8x8xf32>
    %cst_80 = arith.constant dense<0.000000e+00> : vector<8x8xf32>
    %206 = tpu.matmul %203, %204, %cst_80 {dimension_numbers = #tpu.dot_dimension_numbers<[1], [1], [0], [0], [0, 0, 1, 0], [], []>} : vector<8x8xf32>, vector<8x8xf32>, vector<8x8xf32> -> vector<8x8xf32>
    %cst_81 = arith.constant dense<0xFF800000> : vector<8xf32>
    %207 = vector.multi_reduction <maximumf>, %206, %cst_81 [1] : vector<8x8xf32> to vector<8xf32>
    %208 = vector.shape_cast %207 : vector<8xf32> to vector<8x1xf32>
    %209 = vector.broadcast %208 : vector<8x1xf32> to vector<8x8xf32>
    %210 = arith.subf %206, %209 : vector<8x8xf32>
    %211 = math.exp %210 : vector<8x8xf32>
    %cst_82 = arith.constant dense<0.000000e+00> : vector<8xf32>
    %212 = vector.multi_reduction <add>, %211, %cst_82 [1] : vector<8x8xf32> to vector<8xf32>
    %213 = vector.shape_cast %212 : vector<8xf32> to vector<8x1xf32>
    %214 = tpu.reciprocal %213 {approx = true} : vector<8x1xf32> -> vector<8x1xf32>
    %215 = arith.mulf %213, %214 : vector<8x1xf32>
    %cst_83 = arith.constant 2.000000e+00 : f32
    %216 = vector.broadcast %cst_83 : f32 to vector<8x1xf32>
    %217 = arith.subf %216, %215 : vector<8x1xf32>
    %218 = arith.mulf %214, %217 : vector<8x1xf32>
    %cst_84 = arith.constant dense<0.000000e+00> : vector<8x8xf32>
    %219 = tpu.matmul %211, %205, %cst_84 {dimension_numbers = #tpu.dot_dimension_numbers<[1], [0], [0], [1], [0, 0, 1, 1], [], []>} : vector<8x8xf32>, vector<8x8xf32>, vector<8x8xf32> -> vector<8x8xf32>
    %220 = vector.broadcast %218 : vector<8x1xf32> to vector<8x8xf32>
    %221 = arith.mulf %219, %220 : vector<8x8xf32>
    %c0_85 = arith.constant 0 : index
    %c24_86 = arith.constant 24 : index
    %222 = vector.load %arg9[%c0_85, %c24_86] : memref<8x32xf32, #tpu.memory_space<vmem>>, vector<8x8xf32>
    tpu.vector_store %arg9[%c0_85, %c24_86], %221 {strides = array<i32>} : memref<8x32xf32, #tpu.memory_space<vmem>>, vector<8x8xf32>,
    %c0_87 = arith.constant 0 : index
    %c0_88 = arith.constant 0 : index
    %223 = vector.load %arg9[%c0_87, %c0_88] : memref<8x32xf32, #tpu.memory_space<vmem>>, vector<8x32xf32>
    %cst_89 = arith.constant dense<0.000000e+00> : vector<8x32xf32>
    %224 = tpu.matmul %223, %1, %cst_89 {dimension_numbers = #tpu.dot_dimension_numbers<[1], [0], [0], [1], [0, 0, 1, 1], [], []>} : vector<8x32xf32>, vector<32x32xf32>, vector<8x32xf32> -> vector<8x32xf32>
    %225 = vector.broadcast %3 : vector<1x32xf32> to vector<8x32xf32>
    %226 = arith.addf %224, %225 : vector<8x32xf32>
    %227 = arith.addf %131, %226 : vector<8x32xf32>
    %cst_90 = arith.constant dense<0.000000e+00> : vector<8xf32>
    %228 = vector.multi_reduction <add>, %227, %cst_90 [1] : vector<8x32xf32> to vector<8xf32>
    %229 = vector.shape_cast %228 : vector<8xf32> to vector<8x1xf32>
    %cst_91 = arith.constant 3.125000e-02 : f32
    %230 = vector.broadcast %cst_91 : f32 to vector<8x1xf32>
    %231 = arith.mulf %229, %230 : vector<8x1xf32>
    %232 = vector.broadcast %231 : vector<8x1xf32> to vector<8x32xf32>
    %233 = arith.subf %227, %232 : vector<8x32xf32>
    %234 = arith.mulf %233, %233 : vector<8x32xf32>
    %cst_92 = arith.constant dense<0.000000e+00> : vector<8xf32>
    %235 = vector.multi_reduction <add>, %234, %cst_92 [1] : vector<8x32xf32> to vector<8xf32>
    %236 = vector.shape_cast %235 : vector<8xf32> to vector<8x1xf32>
    %cst_93 = arith.constant 3.125000e-02 : f32
    %237 = vector.broadcast %cst_93 : f32 to vector<8x1xf32>
    %238 = arith.mulf %236, %237 : vector<8x1xf32>
    %cst_94 = arith.constant 9.99999974E-6 : f32
    %239 = vector.broadcast %cst_94 : f32 to vector<8x1xf32>
    %240 = arith.addf %238, %239 : vector<8x1xf32>
    %241 = math.rsqrt %240 : vector<8x1xf32>
    %242 = vector.broadcast %241 : vector<8x1xf32> to vector<8x32xf32>
    %243 = arith.mulf %233, %242 : vector<8x32xf32>
    %244 = vector.broadcast %4 : vector<1x32xf32> to vector<8x32xf32>
    %245 = arith.mulf %243, %244 : vector<8x32xf32>
    %246 = vector.broadcast %5 : vector<1x32xf32> to vector<8x32xf32>
    %247 = arith.addf %245, %246 : vector<8x32xf32>
    %248 = arith.index_cast %c1_i32 : i32 to index
    %c0_95 = arith.constant 0 : index
    %c0_96 = arith.constant 0 : index
    %249 = vector.load %arg8[%248, %c0_95, %c0_96] : memref<2x8x32xf32, #tpu.memory_space<vmem>>, vector<1x8x32xf32>
    %250 = vector.shape_cast %249 : vector<1x8x32xf32> to vector<8x32xf32>
    %251 = vector.shape_cast %247 : vector<8x32xf32> to vector<1x8x32xf32>
    tpu.vector_store %arg8[%248, %c0_95, %c0_96], %251 {strides = array<i32>} : memref<2x8x32xf32, #tpu.memory_space<vmem>>, vector<1x8x32xf32>,
    %c2_i32 = arith.constant 2 : i32
    return
  }
  func.func @transform_0(%arg0: i32) -> (i32, i32, i32) {
    %c0_i32 = arith.constant 0 : i32
    %c0_i32_0 = arith.constant 0 : i32
    %c0_i32_1 = arith.constant 0 : i32
    return %arg0, %c0_i32, %c0_i32_0 : i32, i32, i32
  }
  func.func @transform_1(%arg0: i32) -> (i32, i32) {
    %c0_i32 = arith.constant 0 : i32
    %c0_i32_0 = arith.constant 0 : i32
    %c0_i32_1 = arith.constant 0 : i32
    return %c0_i32, %c0_i32_0 : i32, i32
  }
  func.func @transform_2(%arg0: i32) -> (i32, i32) {
    %c0_i32 = arith.constant 0 : i32
    %c0_i32_0 = arith.constant 0 : i32
    %c0_i32_1 = arith.constant 0 : i32
    return %c0_i32, %c0_i32_0 : i32, i32
  }
  func.func @transform_3(%arg0: i32) -> (i32, i32) {
    %c0_i32 = arith.constant 0 : i32
    %c0_i32_0 = arith.constant 0 : i32
    %c0_i32_1 = arith.constant 0 : i32
    return %c0_i32, %c0_i32_0 : i32, i32
  }
  func.func @transform_4(%arg0: i32) -> (i32, i32) {
    %c0_i32 = arith.constant 0 : i32
    %c0_i32_0 = arith.constant 0 : i32
    %c0_i32_1 = arith.constant 0 : i32
    return %c0_i32, %c0_i32_0 : i32, i32
  }
  func.func @transform_5(%arg0: i32) -> (i32, i32) {
    %c0_i32 = arith.constant 0 : i32
    %c0_i32_0 = arith.constant 0 : i32
    %c0_i32_1 = arith.constant 0 : i32
    return %c0_i32, %c0_i32_0 : i32, i32
  }
  func.func @transform_6(%arg0: i32) -> (i32, i32) {
    %c0_i32 = arith.constant 0 : i32
    %c0_i32_0 = arith.constant 0 : i32
    %c0_i32_1 = arith.constant 0 : i32
    return %c0_i32, %c0_i32_0 : i32, i32
  }
  func.func @transform_7(%arg0: i32) -> (i32, i32, i32) {
    %c0_i32 = arith.constant 0 : i32
    %c0_i32_0 = arith.constant 0 : i32
    %c0_i32_1 = arith.constant 0 : i32
    return %arg0, %c0_i32, %c0_i32_0 : i32, i32, i32
  }
}

</mosaic_0001>

<bundles_post_ra>
// kernel: tpu_custom_call.1
= control target key start
LH: loop header
LB: loop body
LE: loop exit
PB: predicated region body
PF: predicated region fallthrough
CT: control target
= control target key end

     0   :  { %12 = vsyncpa [#allocation4], 0  ;;  %s3251_s0 = inlined_call_operand.hbm [shape: f32[4,8,32], index: 0, kind: input, shape index: {}]   ;;  %s3252_s1 = inlined_call_operand.hbm [shape: f32[32,96], index: 1, kind: input, shape index: {}]   ;;  %s3253_s2 = inlined_call_operand.vmem [shape: f32[1,96], index: 2, kind: input, shape index: {}]   ;;  %s3254_s3 = inlined_call_operand.hbm [shape: f32[32,32], index: 3, kind: input, shape index: {}]   ;;  %s3255_s4 = inlined_call_operand.vmem [shape: f32[1,32], index: 4, kind: input, shape index: {}]   ;;  %s3256_s5 = inlined_call_operand.vmem [shape: f32[1,32], index: 5, kind: input, shape index: {}]   ;;  %s3257_s6 = inlined_call_operand.vmem [shape: f32[1,32], index: 6, kind: input, shape index: {}]   ;;  %s3258_s7 = inlined_call_operand.hbm [shape: f32[4,8,32], index: 7, kind: output, shape index: {}]  }
   0x1   :  { %14 = vsyncpa [#allocation4 + $0x1], 0 }
   0x2   :  { %15 = vsyncpa [#allocation7], 0 }
   0x3   :  { %16 = vsyncpa [#allocation5], 0 }
   0x4   :  { %18 = vsyncpa [#allocation5 + $0x1], 0  ;;  %s2784_s24 = smov 0   ;;  %s2786_s25 = smov 0  }
   0x5   :  { %s2788_s26 = smov 0   ;;  %s2790_s27 = smov 0  }
   0x6 LB: > { %s2805_s28 = sadd.s32 4294967295, %s2718_s27   ;;  %s2185_s29 = sadd.s32 4294967294, %s2718_s27   ;;  %s2718_s27 = sphi %s2790_s27, %s3284_s27   ;;  %s2714_s26 = sphi %s2788_s26, %s3283_s26   ;;  %s2710_s25 = sphi %s2786_s25, %s3282_s25   ;;  %s2706_s24 = sphi %s2784_s24, %s3281_s24  }
   0x7   : > { %p44_p0 = scmp.ne.s32.totalorder %s2710_s25, %s2706_s24  ;;  %p3259_p1 = scmp.eq.s32.totalorder %s2805_s28, 0 }
   0x8   : > { %p200_p3 = scmp.eq.s32.totalorder %s2185_s29, 1  ;;  %p2186_p5 = scmp.ge.s32.totalorder %s2718_s27, 1 }
   0x9   : > { %p2814_p4 = por %p3259_p1, %p44_p0  ;;  %p207_p7 = scmp.lt.s32.totalorder %s2718_s27, 3 }
   0xa   : > { %p2819_p6 = por %p200_p3, %p44_p0  ;;  %s2720_s10 = smov [#allocation6]  }
   0xb   : > { %s3265_s30 = scalar_select %p2814_p4, 1, 0 }
   0xc   : > { %s3266_s8 = scalar_select %p2819_p6, 1, 0 }
   0xd   : > { %p2824_p8 = pnand %p2186_p5, %p207_p7  ;;  %s219_s11 = sshll.u32 %s2720_s10, 4  ;;  %s2828_s11 = int_to_ptr.vmem [resolvable:$true] %s219_s11 }
   0xe   : > { %s2721_s13 = smov [#allocation8]   ;;  %s2562_s17 = scalar_lea.hbm %s3252_s1, 512 }
   0xf   : > { %p2451_p9 = pneg %p2824_p8  ;;  %s235_s14 = sshll.u32 %s2721_s13, 4  ;;  %s2839_s14 = int_to_ptr.vmem [resolvable:$true] %s235_s14 }
  0x10   : > { %p2563_p12 = scmp.ne.s32.totalorder %s3252_s1, %s2562_s17  ;;  %p2569_p5 = scmp.lt.u32.totalorder %s2562_s17, %s3252_s1 }
  0x11   : > { %p2835_p11 = pnand %p2451_p9, %p3259_p1 }
  0x13   : > { %p2564_p13 = pneg %p2835_p11 }
  0x15   : > { %p2565_p0 = pnand %p2564_p13, %p2563_p12 }
  0x17   : > { %p2566_p3 = pneg %p2565_p0 }
  0x19   : > { %p2571_p7 = pnand %p2569_p5, %p2566_p3 }
  0x1b   : > { %2574 = shalt.err (!%p2571_p7)
}
  0x1c   : > { %s2575_s22 = scalar_lea.vmem %s2828_s11, 512  ;;  %p2583_p2 = scmp.lt.s32.totalorder %s2828_s11, %s2828_s11 }
  0x1d   : > { %p2576_p9 = scmp.ne.s32.totalorder %s2828_s11, %s2575_s22  ;;  %p2584_p12 = scmp.lt.s32.totalorder %s2575_s22, %s2575_s22 }
  0x1f   : > { %p2578_p10 = pnand %p2576_p9, %p2564_p13  ;;  %p2585_p0 = por %p2584_p12, %p2583_p2 }
  0x21   : > { %p2579_p1 = pneg %p2578_p10 }
  0x23   : > { %p2586_p6 = pnand %p2585_p0, %p2579_p1 }
  0x25   : > { %2589 = shalt.err (!%p2586_p6)
}
  0x26   : > { %s3260_s23 = smov 128   ;;  %s2723_s29 = smov 8  }
  0x27   : > { %2454 = dma.hbm_to_vmem [thread:$0]  (!%p2835_p11), %s3252_s1, 512, %s2828_s11, [#allocation7], %s3260_s23, %s3260_s23, %s2723_s29  }
  0x28   : > { %s2590_s17 = scalar_lea.hbm %s3254_s3, 512 }
  0x29   : > { %p2591_p1 = scmp.ne.s32.totalorder %s3254_s3, %s2590_s17  ;;  %p2597_p10 = scmp.lt.u32.totalorder %s2590_s17, %s3254_s3 }
  0x2b   : > { %p2593_p2 = pnand %p2591_p1, %p2564_p13 }
  0x2d   : > { %p2594_p6 = pneg %p2593_p2 }
  0x2f   : > { %p2599_p3 = pnand %p2597_p10, %p2594_p6 }
  0x31   : > { %2602 = shalt.err (!%p2599_p3)
}
  0x32   : > { %s2603_s11 = scalar_lea.vmem %s2839_s14, 512  ;;  %p2611_p12 = scmp.lt.s32.totalorder %s2839_s14, %s2839_s14 }
  0x33   : > { %p2604_p5 = scmp.ne.s32.totalorder %s2839_s14, %s2603_s11  ;;  %p2612_p0 = scmp.lt.s32.totalorder %s2603_s11, %s2603_s11 }
  0x35   : > { %p2606_p7 = pnand %p2604_p5, %p2564_p13  ;;  %p2613_p1 = por %p2612_p0, %p2611_p12 }
  0x37   : > { %p2607_p9 = pneg %p2606_p7 }
  0x39   : > { %p2614_p2 = pnand %p2613_p1, %p2607_p9 }
  0x3b   : > { %2617 = shalt.err (!%p2614_p2)
}
  0x3c   : > { %2457 = dma.hbm_to_vmem [thread:$0]  (!%p2835_p11), %s3254_s3, 512, %s2839_s14, [#allocation7], %s3260_s23, %s3260_s23, %s2723_s29  }
  0x3d   : > { %s2900_s12 = sadd.s32 1, %s2718_s27   ;;  %s31_s13 = sadd.s32 1, %s2714_s26 }
  0x3e   : > { %s28_s15 = ssub.s32 %s2718_s27, %s2900_s12  ;;  %p38_p13 = scmp.ne.s32.totalorder %s2714_s26, %s2710_s25 }
  0x3f   : > { %p29_p6 = scmp.eq.s32.totalorder %s28_s15, 0  ;;  %p39_p10 = scmp.eq.s32.totalorder %s2718_s27, 0 }
  0x40   : > { %p3269_p3 = scmp.eq.s32.totalorder %s2805_s28, 1  ;;  %p2468_p7 = scmp.lt.s32.totalorder %s2718_s27, 2 }
  0x41   : > { %s2916_s17 = scalar_select %p29_p6, %s2714_s26, %s31_s13  }
  0x42   : > { %p2910_p5 = por %p3269_p3, %p38_p13  ;;  %p40_p9 = por %p39_p10, %p38_p13 }
  0x43   : > { %s258_s18 = sand.u32 1, %s2714_s26   ;;  %s2237_s14 = sshll.u32 %s2718_s27, 8 }
  0x44   : > { %s3270_s16 = scalar_select %p2910_p5, 1, 0 }
  0x45   : > { %s2190_s19 = sshll.u32 %s258_s18, 4  ;;  %s2923_s11 = scalar_lea.hbm %s3251_s0, %s2237_s14 }
  0x46   : > { %s262_s22 = scalar_lea.vmem [#allocation3], %s2190_s19  ;;  %p2927_p11 = pnand %p2468_p7, %p40_p9 }
  0x47   : > { %s269_s10 = sshll.u32 %s262_s22, 4  ;;  %s2931_s15 = scalar_lea.sflag [#allocation4], %s258_s18  ;;  %s2925_s10 = int_to_ptr.vmem [resolvable:$true] %s269_s10 }
  0x48   : > { %s2618_s23 = scalar_lea.hbm %s2923_s11, 256  ;;  %p2620_p0 = pneg %p2927_p11 }
  0x49   : > { %p2619_p12 = scmp.ne.s32.totalorder %s2923_s11, %s2618_s23  ;;  %s2623_s20 = scalar_lea.hbm %s3251_s0, 512 }
  0x4a   : > { %p2624_p13 = scmp.lt.u32.totalorder %s2923_s11, %s3251_s0  ;;  %p2625_p6 = scmp.lt.u32.totalorder %s2623_s20, %s2618_s23 }
  0x4b   : > { %p2621_p1 = pnand %p2620_p0, %p2619_p12  ;;  %p2627_p3 = scmp.lt.u32.totalorder %s2618_s23, %s2923_s11 }
  0x4c   : > { %p2626_p10 = por %p2625_p6, %p2624_p13 }
  0x4d   : > { %p2622_p2 = pneg %p2621_p1 }
  0x4e   : > { %p2628_p7 = por %p2627_p3, %p2626_p10 }
  0x50   : > { %p2629_p9 = pnand %p2628_p7, %p2622_p2 }
  0x52   : > { %2632 = shalt.err (!%p2629_p9)
}
  0x53   : > { %s2633_s18 = scalar_lea.vmem %s2925_s10, 256  ;;  %s2724_s19 = smov [#allocation3]  }
  0x54   : > { %p2634_p12 = scmp.ne.s32.totalorder %s2925_s10, %s2633_s18  ;;  %s2638_s14 = sshll.u32 %s2724_s19, 4  ;;  %s2639_s14 = int_to_ptr.vmem [resolvable:$false] %s2638_s14 }
  0x55   : > { %s2640_s21 = scalar_lea.vmem %s2639_s14, 512  ;;  %p2641_p4 = scmp.lt.s32.totalorder %s2925_s10, %s2639_s14 }
  0x56   : > { %p2636_p1 = pnand %p2634_p12, %p2620_p0  ;;  %p2642_p13 = scmp.lt.s32.totalorder %s2640_s21, %s2633_s18 }
  0x58   : > { %p2637_p5 = pneg %p2636_p1  ;;  %p2643_p6 = por %p2642_p13, %p2641_p4 }
  0x5a   : > { %p2644_p10 = pnand %p2643_p6, %p2637_p5 }
  0x5c   : > { %2647 = shalt.err (!%p2644_p10)
}
  0x5d   : > { %s3272_s23 = smov 128   ;;  %281 = sbr.rel (%p2824_p8) target bundleno = 2843 (0xb1b), region = 48 }
  0x5e   : > { %2461 = dma.hbm_to_vmem [thread:$0]  (!%p2927_p11), %s2923_s11, 256, %s2925_s10, %s2931_s15, %s3272_s23, %s3272_s23, %s2723_s29  }
  0x5f   : > { %s2965_s20 = sand.u32 (!%p2824_p8), 1, %s2710_s25   ;;  %p3273_p4 = scmp.ne.s32.totalorder (!%p2824_p8), %s3265_s30, 0 }
  0x60   : > { %s3263_s22 = sshll.u32 (!%p2824_p8), %s2965_s20, 4  ;;  %s284_s18 = scalar_lea.sflag (!%p2824_p8), [#allocation4], %s2965_s20 }
  0x61   : > { %s2971_s13 = scalar_lea.vmem (!%p2824_p8), [#allocation3], %s3263_s22 }
  0x64   : > { %2693 = dma.done.wait (%p3273_p4), %s284_s18, 256  }
  0x65   : > { %2695 = vsyncadd (%p3273_p4), %s284_s18, 4294967040  ;;  %p3274_p5 = scmp.eq.s32.totalorder %s2805_s28, 0 }
  0x67   : > { %2697 = dma.done.wait (%p3274_p5), [#allocation7], 1024   ;;  %p3275_p8 = pmov %p3274_p5 }
  0x68   : > { %v2725_v0 = vmov 0.0|0.0   ;;  %vm2726_vm0 = vmmov 0   ;;  %v2727_v1 = vmov 0.0   ;;  %v328_v2 = vld [vmem:[#allocation6] sm:$0xff]  ;;  %v329_v3 = vld [vmem:[#allocation6 + $0x8] sm:$0xff]  ;;  %v330_v4 = vld [vmem:[#allocation6 + $0x10] sm:$0xff] }
  0x69   : > { %2699 = vsyncadd (%p3275_p8), [#allocation7], 4294966272  ;;  %2415 = vmatprep.subr.bf16.mxu0 %v2725_v0  ;;  %2299 = vmatprep.mubr.msk.f32.mxu0 %vm2726_vm0, %v2727_v1  ;;  %v2987_v5 = vpack.c.bf16 %v329_v3, %v328_v2  ;;  %v331_v6 = vld [vmem:[#allocation6 + $0x18] sm:$0xff]  ;;  %v2995_v8 = vld [vmem:[%s2971_s13] sm:$0xff]  ;;  %vm347_vm1 = vcmask 261120   ;;  %s2728_s29 = smov 64  }
  0x6a   : > { %2302 = vmatprep.subr.mxu1 %v2727_v1  ;;  %2304 = vmatprep.mubr.msk.f32.mxu1 %vm2726_vm0, %v2727_v1  ;;  %v2990_v7 = vpack.c.bf16 %v331_v6, %v330_v4  ;;  %v3005_v9 = vld [vmem:[%s3253_s2] ss:$0 sm:$0xff]  ;;  %s2729_s11 = smov 96   ;;  %s2730_s10 = smov 88   ;;  %vm425_vm2 = vcmask 64512   ;;  %vm764_vm3 = vcmask 130112  }
  0x6b   : > { %2417 = vmatpush3.bf16.msra.mxu0 %v2987_v5  ;;  %s2731_s15 = smov 120   ;;  %s2732_s19 = smov 80   ;;  %v3078_v59 = vld [vmem:[%s2971_s13 + $0x8] sm:$0xff]  ;;  %vm938_vm4 = vcmask 195712   ;;  %vm1112_vm5 = vcmask 261312  }
  0x6c   : > { %2418 = vmatprep.subr.bf16.mxu0 %v2725_v0  ;;  %s2733_s14 = smov 112   ;;  %s2734_s21 = smov 72  }
  0x6d   : > { %s2735_s23 = smov 104   ;;  %s2736_s18 = smov 56  }
  0x6e   : > { %s2737_s30 = smov 40   ;;  %s3264_s9 = smov 48  }
  0x6f   : > { %2420 = vmatpush3.bf16.msra.mxu0 %v2990_v7  ;;  %s2739_s13 = smov 8   ;;  %s2740_s22 = smov 16  }
  0x70   : > { %2322 = vmatprep.subr.mxu0 %v2727_v1  ;;  %p3278_p0 = scmp.ne.s32.totalorder %s3270_s16, 0 }
  0x72   : > { %2300 = vmatmul.mubr.msk.f32.vlgmr.msra.gmra.mrb[0].mxu0 %vm347_vm1, %v2995_v8 }
  0x73   : > { %2324 = vmatprep.mubr.msk.f32.mxu0 %vm2726_vm0, %v2727_v1 }
 0x145   : > { %v417_v10 = vpop.f32.mrb[0].mxu0 }
 0x146   : > { %v3008_v11 = vadd.f32 %v3005_v9, %v417_v10  ;;  %v2301_v12 = vpop.f32.mrb[1].mxu0  ;;  %v332_v10 = vld [vmem:[#allocation8] sm:$0xff] }
 0x148   : > { %514 = vrot.lane.b32.xlu1 %v3008_v11, %s2728_s29  ;;  %423 = vrot.lane.b32.xlu0 %v3008_v11, %s2729_s11  ;;  %v421_v13 = vmul.f32 0.35355338, %v3008_v11 }
 0x14c   : > { %594 = vrot.lane.b32.xlu1 %v3008_v11, %s2730_s10 }
 0x150   : > { %592 = vrot.lane.b32.xlu1 %v421_v13, %s2731_s15 }
 0x154   : > { %768 = vrot.lane.b32.xlu1 %v3008_v11, %s2732_s19 }
 0x158   : > { %766 = vrot.lane.b32.xlu1 %v421_v13, %s2733_s14 }
 0x15c   : > { %942 = vrot.lane.b32.xlu1 %v3008_v11, %s2734_s21 }
 0x160   : > { %940 = vrot.lane.b32.xlu1 %v421_v13, %s2735_s23 }
 0x1ba   : > { %v515_v14 = vpop.permute.xlu1 %514  ;;  %v424_v15 = vpop.permute.xlu0 %423 }
 0x1bb   : > { %2303 = vmatpush3.xpose.msk.msra.mxu1 %vm425_vm2, %v424_v15  ;;  %v334_v15 = vld [vmem:[#allocation8 + $0x10] sm:$0xff] }
 0x1bc   : > { %2307 = vmatprep.subr.mxu1 %v2727_v1 }
 0x1be   : > { %v595_v16 = vpop.permute.xlu1 %594  ;;  %2305 = vmatmul.mubr.msk.f32.vlgmr.msra.gmra.mrb[0].mxu1 %vm425_vm2, %v421_v13 }
 0x1bf   : > { %2308 = vmatpush3.msra.mxu1 %v515_v14  ;;  %2309 = vmatprep.mubr.msk.f32.mxu1 %vm2726_vm0, %v2727_v1 }
 0x1c0   : > { %2312 = vmatprep.subr.mxu1 %v2727_v1 }
 0x1c2   : > { %v593_v17 = vpop.permute.xlu1 %592 }
 0x1c6   : > { %v769_v18 = vpop.permute.xlu1 %768 }
 0x1c7   : > { %2323 = vmatpush3.xpose.msk.msra.mxu0 %vm425_vm2, %v769_v18 }
 0x1c8   : > { %2332 = vmatprep.subr.mxu0 %v2727_v1 }
 0x1ca   : > { %v767_v19 = vpop.permute.xlu1 %766 }
 0x1cb   : > { %2325 = vmatmul.mubr.msk.f32.vlgmr.msra.gmra.mrb[2].mxu0 %vm425_vm2, %v767_v19 }
 0x1cc   : > { %2334 = vmatprep.mubr.msk.f32.mxu0 %vm2726_vm0, %v2727_v1 }
 0x1ce   : > { %v943_v20 = vpop.permute.xlu1 %942 }
 0x1cf   : > { %2333 = vmatpush3.xpose.msk.msra.mxu0 %vm425_vm2, %v943_v20 }
 0x1d0   : > { %2421 = vmatprep.subr.bf16.mxu0 %v2725_v0 }
 0x1d2   : > { %v941_v21 = vpop.permute.xlu1 %940 }
 0x1d3   : > { %2335 = vmatmul.mubr.msk.f32.vlgmr.msra.gmra.mrb[4].mxu0 %vm425_vm2, %v941_v21 }
 0x1d4   : > { %2350 = vmatprep.mubr.msk.f32.mxu0 %vm2726_vm0, %v2727_v1 }
 0x291   : > { %v497_v22 = vpop.f32.mrb[0].mxu1 }
 0x292   : > { %v2306_v23 = vpop.f32.mrb[1].mxu1  ;;  %v501_v24 = vsel %vm425_vm2, %v497_v22, -inf }
 0x293   : > { %502 = vmax.xlane.f32.xlu0 %v501_v24 }
 0x29e   : > { %v840_v25 = vpop.f32.mrb[2].mxu0 }
 0x29f   : > { %v2326_v26 = vpop.f32.mrb[3].mxu0  ;;  %v844_v29 = vsel %vm425_vm2, %v840_v25, -inf }
 0x2a6   : > { %v1014_v27 = vpop.f32.mrb[4].mxu0 }
 0x2a7   : > { %v2336_v28 = vpop.f32.mrb[5].mxu0  ;;  %v1018_v30 = vsel %vm425_vm2, %v1014_v27, -inf }
 0x2a9   : > { %683 = vrot.lane.b32.xlu0 %v3008_v11, %s2736_s18 }
 0x2c8   : > { %845 = vmax.xlane.f32.xlu0 %v844_v29 }
 0x2cc   : > { %1019 = vmax.xlane.f32.xlu0 %v1018_v30 }
 0x2e2   : > { %1031 = vrot.lane.b32.xlu0 %v3008_v11, %s2737_s30 }
 0x320   : > { %v503_v31 = vpop.xlane.xlu0 %502 }
 0x321   : > { %v504_v32 = vsub.f32 %v497_v22, %v503_v31 }
 0x323   : > { %v505_v33 = vmul.f32 1.442695, %v504_v32 }
 0x324   : > { %v684_v35 = vpop.permute.xlu0 %683 }
 0x325   : > { %2526 = vpow2.f32 %v505_v33 }
 0x32f   : > { %v2527_v34 = vpop.eup %2526 }
 0x330   : > { %2310 = vmatmul.mubr.msk.f32.vlgmr.msra.gmra.mrb[2].mxu1 %vm425_vm2, %v2527_v34  ;;  %v507_v58 = vsel %vm425_vm2, %v2527_v34, 0.0 }
 0x331   : > { %2313 = vmatpush3.xpose.msk.msra.mxu1 %vm425_vm2, %v595_v16  ;;  %2314 = vmatprep.mubr.msk.f32.mxu1 %vm2726_vm0, %v2727_v1  ;;  %v335_v16 = vld [vmem:[#allocation8 + $0x18] sm:$0xff] }
 0x332   : > { %2317 = vmatprep.subr.mxu1 %v2727_v1  ;;  %v3090_v19 = vpack.c.bf16 %v335_v16, %v334_v15 }
 0x334   : > { %2315 = vmatmul.mubr.msk.f32.vlgmr.msra.gmra.mrb[4].mxu1 %vm425_vm2, %v593_v17 }
 0x335   : > { %2318 = vmatpush3.msra.mxu1 %v684_v35  ;;  %2319 = vmatprep.mubr.msk.f32.mxu1 %vm2726_vm0, %v2727_v1 }
 0x336   : > { %2327 = vmatprep.subr.mxu1 %v2727_v1 }
 0x355   : > { %v846_v41 = vpop.xlane.xlu0 %845 }
 0x356   : > { %v847_v42 = vsub.f32 %v840_v25, %v846_v41 }
 0x358   : > { %v848_v43 = vmul.f32 1.442695, %v847_v42 }
 0x359   : > { %v1020_v46 = vpop.xlane.xlu0 %1019 }
 0x35a   : > { %2528 = vpow2.f32 %v848_v43  ;;  %v1021_v47 = vsub.f32 %v1014_v27, %v1020_v46 }
 0x35c   : > { %v1022_v50 = vmul.f32 1.442695, %v1021_v47 }
 0x35d   : > { %v1032_v56 = vpop.permute.xlu0 %1031 }
 0x364   : > { %v2529_v44 = vpop.eup %2528 }
 0x365   : > { %v850_v45 = vsel %vm425_vm2, %v2529_v44, 0.0 }
 0x403   : > { %v586_v36 = vpop.f32.mrb[2].mxu1 }
 0x404   : > { %v2311_v37 = vpop.f32.mrb[3].mxu1 }
 0x407   : > { %v666_v38 = vpop.f32.mrb[4].mxu1 }
 0x408   : > { %v2316_v39 = vpop.f32.mrb[5].mxu1  ;;  %v670_v40 = vsel %vm425_vm2, %v666_v38, -inf }
 0x409   : > { %671 = vmax.xlane.f32.xlu1 %v670_v40 }
 0x41a   : > { %857 = vrot.lane.b32.xlu1 %v3008_v11, %s3264_s9  ;;  %v333_v11 = vld [vmem:[#allocation8 + $0x8] sm:$0xff]  ;;  %s2741_s9 = smov 24  }
 0x41b   : > { %v3086_v13 = vpack.c.bf16 %v333_v11, %v332_v10 }
 0x41d   : > { %2423 = vmatpush3.bf16.msra.mxu0 %v3086_v13 }
 0x41e   : > { %2424 = vmatprep.subr.bf16.mxu0 %v2725_v0 }
 0x421   : > { %2426 = vmatpush3.bf16.msra.mxu0 %v3090_v19 }
 0x422   : > { %2364 = vmatprep.subr.mxu0 %v2727_v1 }
 0x43e   : > { %851 = vadd.xlane.f32.xlu1 %v850_v45 }
 0x496   : > { %v672_v48 = vpop.xlane.xlu1 %671 }
 0x497   : > { %v673_v49 = vsub.f32 %v666_v38, %v672_v48 }
 0x499   : > { %v674_v51 = vmul.f32 1.442695, %v673_v49 }
 0x49a   : > { %v858_v53 = vpop.permute.xlu1 %857 }
 0x49b   : > { %2530 = vpow2.f32 %v674_v51 }
 0x49c   : > { %2532 = vpow2.f32 %v1022_v50 }
 0x4a5   : > { %v2531_v52 = vpop.eup %2530 }
 0x4a6   : > { %2320 = vmatmul.mubr.msk.f32.vlgmr.msra.gmra.mrb[6].mxu1 %vm425_vm2, %v2531_v52  ;;  %v676_v54 = vsel %vm425_vm2, %v2531_v52, 0.0  ;;  %v2533_v55 = vpop.eup %2532 }
 0x4a7   : > { %2328 = vmatpush3.msra.mxu1 %v858_v53  ;;  %677 = vadd.xlane.f32.xlu0 %v676_v54  ;;  %v1024_v57 = vsel %vm425_vm2, %v2533_v55, 0.0 }
 0x4a8   : > { %2329 = vmatprep.mubr.msk.f32.mxu1 %vm2726_vm0, %v2727_v1  ;;  %2337 = vmatprep.subr.mxu1 %v2727_v1 }
 0x4aa   : > { %2330 = vmatmul.mubr.msk.f32.vlgmr.msra.gmra.mrb[8].mxu1 %vm425_vm2, %v2529_v44 }
 0x4ab   : > { %2338 = vmatpush3.msra.mxu1 %v1032_v56  ;;  %1025 = vadd.xlane.f32.xlu0 %v1024_v57 }
 0x4ac   : > { %2339 = vmatprep.mubr.msk.f32.mxu1 %vm2726_vm0, %v2727_v1  ;;  %2427 = vmatprep.subr.bf16.mxu1 %v2725_v0 }
 0x4ae   : > { %2340 = vmatmul.mubr.msk.f32.vlgmr.msra.gmra.mrb[10].mxu1 %vm425_vm2, %v2533_v55 }
 0x4af   : > { %2429 = vmatpush3.bf16.msra.mxu1 %v2987_v5  ;;  %508 = vadd.xlane.f32.xlu0 %v507_v58 }
 0x4b0   : > { %2430 = vmatprep.subr.bf16.mxu1 %v2725_v0  ;;  %2361 = vmatprep.mubr.msk.f32.mxu1 %vm2726_vm0, %v2727_v1 }
 0x4b3   : > { %2432 = vmatpush3.bf16.msra.mxu1 %v2990_v7 }
 0x4b4   : > { %2369 = vmatprep.subr.mxu1 %v2727_v1 }
 0x4b6   : > { %2362 = vmatmul.mubr.msk.f32.vlgmr.msra.gmra.mrb[12].mxu1 %vm347_vm1, %v3078_v59 }
 0x4b7   : > { %2371 = vmatprep.mubr.msk.f32.mxu1 %vm2726_vm0, %v2727_v1 }
 0x4cb   : > { %v852_v6 = vpop.xlane.xlu1 %851 }
 0x534   : > { %v678_v60 = vpop.xlane.xlu0 %677 }
 0x538   : > { %v1026_v61 = vpop.xlane.xlu0 %1025 }
 0x53c   : > { %v509_v62 = vpop.xlane.xlu0 %508 }
 0x53d   : > { %2534 = vrcp.f32 %v509_v62 }
 0x53e   : > { %2536 = vrcp.f32 %v678_v60 }
 0x53f   : > { %2538 = vrcp.f32 %v852_v6 }
 0x540   : > { %2540 = vrcp.f32 %v1026_v61 }
 0x547   : > { %v2535_v63 = vpop.eup %2534 }
 0x548   : > { %v511_v2 = vmul.f32 %v2535_v63, %v509_v62  ;;  %v2537_v7 = vpop.eup %2536 }
 0x549   : > { %v680_v12 = vmul.f32 %v2537_v7, %v678_v60  ;;  %v2539_v14 = vpop.eup %2538 }
 0x54a   : > { %v512_v3 = vsub.f32 2.0, %v511_v2  ;;  %v854_v17 = vmul.f32 %v2539_v14, %v852_v6  ;;  %v2541_v20 = vpop.eup %2540 }
 0x54b   : > { %v681_v18 = vsub.f32 2.0, %v680_v12  ;;  %v1028_v22 = vmul.f32 %v2541_v20, %v1026_v61 }
 0x54c   : > { %v513_v4 = vmul.f32 %v2535_v63, %v512_v3  ;;  %v855_v21 = vsub.f32 2.0, %v854_v17 }
 0x54d   : > { %v682_v23 = vmul.f32 %v2537_v7, %v681_v18  ;;  %v1029_v27 = vsub.f32 2.0, %v1028_v22 }
 0x54e   : > { %v590_v5 = vmul.f32 %v586_v36, %v513_v4  ;;  %v856_v28 = vmul.f32 %v2539_v14, %v855_v21 }
 0x54f   : > { %v1030_v32 = vmul.f32 %v2541_v20, %v1029_v27 }
 0x550   : > { %591 = vst.msk [vmem:[#allocation2] sm:$0xff] %vm425_vm2, %v590_v5 }
 0x579   : > { %v755_v24 = vpop.f32.mrb[6].mxu1 }
 0x57a   : > { %v759_v25 = vmul.f32 %v755_v24, %v682_v23  ;;  %v2321_v26 = vpop.f32.mrb[7].mxu1 }
 0x57c   : > { %761 = vrot.lane.b32.xlu0 %v759_v25, %s2739_s13 }
 0x57d   : > { %v929_v29 = vpop.f32.mrb[8].mxu1 }
 0x57e   : > { %v933_v30 = vmul.f32 %v929_v29, %v856_v28  ;;  %v2331_v31 = vpop.f32.mrb[9].mxu1 }
 0x580   : > { %935 = vrot.lane.b32.xlu1 %v933_v30, %s2740_s22 }
 0x581   : > { %v1103_v33 = vpop.f32.mrb[10].mxu1 }
 0x582   : > { %v1107_v34 = vmul.f32 %v1103_v33, %v1030_v32  ;;  %v2341_v35 = vpop.f32.mrb[11].mxu1 }
 0x584   : > { %1109 = vrot.lane.b32.xlu0 %v1107_v34, %s2741_s9 }
 0x589   : > { %v1294_v36 = vpop.f32.mrb[12].mxu1 }
 0x58a   : > { %v3098_v37 = vadd.f32 %v3005_v9, %v1294_v36  ;;  %v2363_v38 = vpop.f32.mrb[13].mxu1 }
 0x58c   : > { %1470 = vrot.lane.b32.xlu1 %v3098_v37, %s2730_s10  ;;  %1300 = vrot.lane.b32.xlu0 %v3098_v37, %s2729_s11  ;;  %v1298_v39 = vmul.f32 0.35355338, %v3098_v37  ;;  %s3276_s11 = smov 48   ;;  %s2080_s10 = scalar_lea.sflag [#allocation5], %s2965_s20 }
 0x590   : > { %1643 = vrot.lane.b32.xlu1 %v3098_v37, %s2732_s19  ;;  %1468 = vrot.lane.b32.xlu0 %v1298_v39, %s2731_s15 }
 0x594   : > { %1816 = vrot.lane.b32.xlu1 %v3098_v37, %s2734_s21  ;;  %1641 = vrot.lane.b32.xlu0 %v1298_v39, %s2733_s14  ;;  %s3277_s21 = sshll.u32 %s2965_s20, 4 }
 0x598   : > { %1814 = vrot.lane.b32.xlu0 %v1298_v39, %s2735_s23  ;;  %s325_s23 = scalar_lea.vmem [#allocation9], %s3277_s21 }
 0x5ee   : > { %v762_v9 = vpop.permute.xlu0 %761 }
 0x5ef   : > { %765 = vst.msk [vmem:[#allocation2] sm:$0xff] %vm764_vm3, %v762_v9 }
 0x5f2   : > { %v936_v40 = vpop.permute.xlu1 %935 }
 0x5f3   : > { %939 = vst.msk [vmem:[#allocation2] sm:$0xff] %vm938_vm4, %v936_v40 }
 0x5f6   : > { %v1110_v41 = vpop.permute.xlu0 %1109 }
 0x5f7   : > { %1113 = vst.msk [vmem:[#allocation2] sm:$0xff] %vm1112_vm5, %v1110_v41 }
 0x5fe   : > { %v1301_v42 = vpop.permute.xlu0 %1300  ;;  %v1114_v43 = vld [vmem:[#allocation2] sm:$0xff]  ;;  %v1471_v44 = vpop.permute.xlu1 %1470 }
 0x5ff   : > { %2351 = vmatmul.mubr.msk.f32.vlgmr.msra.gmra.mrb[6].mxu0 %vm347_vm1, %v1114_v43  ;;  %v2212_v43 = vld [vmem:[%s3255_s4] ss:$0 sm:$0xff] }
 0x600   : > { %2365 = vmatpush3.xpose.msk.msra.mxu0 %vm425_vm2, %v1301_v42  ;;  %2366 = vmatprep.mubr.msk.f32.mxu0 %vm2726_vm0, %v2727_v1 }
 0x601   : > { %2374 = vmatprep.subr.mxu0 %v2727_v1 }
 0x602   : > { %v1469_v45 = vpop.permute.xlu0 %1468  ;;  %v1644_v46 = vpop.permute.xlu1 %1643 }
 0x603   : > { %2367 = vmatmul.mubr.msk.f32.vlgmr.msra.gmra.mrb[8].mxu0 %vm425_vm2, %v1298_v39 }
 0x604   : > { %2375 = vmatpush3.xpose.msk.msra.mxu0 %vm425_vm2, %v1471_v44  ;;  %2376 = vmatprep.mubr.msk.f32.mxu0 %vm2726_vm0, %v2727_v1 }
 0x605   : > { %2384 = vmatprep.subr.mxu0 %v2727_v1 }
 0x606   : > { %v1642_v47 = vpop.permute.xlu0 %1641  ;;  %v1817_v48 = vpop.permute.xlu1 %1816 }
 0x607   : > { %2377 = vmatmul.mubr.msk.f32.vlgmr.msra.gmra.mrb[10].mxu0 %vm425_vm2, %v1469_v45 }
 0x608   : > { %2385 = vmatpush3.xpose.msk.msra.mxu0 %vm425_vm2, %v1644_v46  ;;  %2386 = vmatprep.mubr.msk.f32.mxu0 %vm2726_vm0, %v2727_v1 }
 0x609   : > { %2394 = vmatprep.subr.mxu0 %v2727_v1 }
 0x60a   : > { %v1815_v49 = vpop.permute.xlu0 %1814 }
 0x60b   : > { %2387 = vmatmul.mubr.msk.f32.vlgmr.msra.gmra.mrb[12].mxu0 %vm425_vm2, %v1642_v47 }
 0x60c   : > { %2395 = vmatpush3.xpose.msk.msra.mxu0 %vm425_vm2, %v1817_v48  ;;  %2396 = vmatprep.mubr.msk.f32.mxu0 %vm2726_vm0, %v2727_v1 }
 0x60d   : > { %2433 = vmatprep.subr.bf16.mxu0 %v2725_v0 }
 0x60f   : > { %2397 = vmatmul.mubr.msk.f32.vlgmr.msra.gmra.mrb[14].mxu0 %vm425_vm2, %v1815_v49 }
 0x610   : > { %2435 = vmatpush3.bf16.msra.mxu0 %v3086_v13  ;;  %2412 = vmatprep.mubr.msk.f32.mxu0 %vm2726_vm0, %v2727_v1 }
 0x611   : > { %2436 = vmatprep.subr.bf16.mxu0 %v2725_v0 }
 0x614   : > { %2438 = vmatpush3.bf16.msra.mxu0 %v3090_v19 }
 0x6d2   : > { %v3141_v50 = vpop.f32.mrb[6].mxu0 }
 0x6d3   : > { %v2352_v51 = vpop.f32.mrb[7].mxu0  ;;  %v1191_v45 = vadd.f32 %v2212_v43, %v3141_v50 }
 0x6d5   : > { %v1194_v47 = vadd.f32 %v1191_v45, %v2995_v8 }
 0x6d6   : > { %v1373_v52 = vpop.f32.mrb[8].mxu0 }
 0x6d7   : > { %v2368_v53 = vpop.f32.mrb[9].mxu0  ;;  %v1377_v54 = vsel %vm425_vm2, %v1373_v52, -inf  ;;  %v1195_v49 = vsel %vm347_vm1, %v1194_v47, 0.0 }
 0x6d8   : > { %1378 = vmax.xlane.f32.xlu1 %v1377_v54 }
 0x6da   : > { %v1542_v55 = vpop.f32.mrb[10].mxu0 }
 0x6db   : > { %v2378_v56 = vpop.f32.mrb[11].mxu0  ;;  %v1546_v57 = vsel %vm425_vm2, %v1542_v55, -inf }
 0x6dc   : > { %1547 = vmax.xlane.f32.xlu0 %v1546_v57 }
 0x6de   : > { %v1715_v58 = vpop.f32.mrb[12].mxu0 }
 0x6df   : > { %v2388_v60 = vpop.f32.mrb[13].mxu0  ;;  %v1719_v61 = vsel %vm425_vm2, %v1715_v58, -inf }
 0x6e0   : > { %1720 = vmax.xlane.f32.xlu0 %v1719_v61 }
 0x6e2   : > { %v1888_v0 = vpop.f32.mrb[14].mxu0 }
 0x6e3   : > { %v2398_v62 = vpop.f32.mrb[15].mxu0  ;;  %v1892_v63 = vsel %vm425_vm2, %v1888_v0, -inf }
 0x6e9   : > { %1559 = vrot.lane.b32.xlu1 %v3098_v37, %s2736_s18  ;;  %s2238_s18 = sshll.u32 %s2805_s28, 8  ;;  %s2742_s28 = smov [#allocation9]  }
 0x6ea   : > { %s2652_s15 = sshll.u32 %s2742_s28, 4  ;;  %s2653_s15 = int_to_ptr.vmem [resolvable:$false] %s2652_s15 }
 0x6eb   : > { %s2654_s19 = scalar_lea.vmem %s2653_s15, 512 }
 0x6f6   : > { %1390 = vrot.lane.b32.xlu0 %v3098_v37, %s2728_s29  ;;  %s3203_s29 = scalar_lea.hbm %s3258_s7, %s2238_s18 }
 0x6fa   : > { %1905 = vrot.lane.b32.xlu0 %v3098_v37, %s2737_s30  ;;  %s2093_s30 = sshll.u32 %s325_s23, 4  ;;  %s3205_s30 = int_to_ptr.vmem [resolvable:$true] %s2093_s30 }
 0x6fb   : > { %p2655_p7 = scmp.lt.s32.totalorder %s3205_s30, %s2653_s15 }
 0x70d   : > { %1893 = vmax.xlane.f32.xlu1 %v1892_v63 }
 0x71e   : > { %1732 = vrot.lane.b32.xlu1 %v3098_v37, %s3276_s11 }
 0x765   : > { %v1379_v2 = vpop.xlane.xlu1 %1378 }
 0x766   : > { %v1380_v3 = vsub.f32 %v1373_v52, %v1379_v2 }
 0x768   : > { %v1381_v4 = vmul.f32 1.442695, %v1380_v3 }
 0x769   : > { %v1548_v5 = vpop.xlane.xlu0 %1547  ;;  %v1560_v15 = vpop.permute.xlu1 %1559 }
 0x76a   : > { %2542 = vpow2.f32 %v1381_v4  ;;  %v1549_v6 = vsub.f32 %v1542_v55, %v1548_v5 }
 0x76c   : > { %v1550_v7 = vmul.f32 1.442695, %v1549_v6 }
 0x76d   : > { %v1721_v10 = vpop.xlane.xlu0 %1720 }
 0x76e   : > { %2544 = vpow2.f32 %v1550_v7  ;;  %v1722_v11 = vsub.f32 %v1715_v58, %v1721_v10 }
 0x770   : > { %v1723_v12 = vmul.f32 1.442695, %v1722_v11 }
 0x771   : > { %v1391_v13 = vpop.permute.xlu0 %1390 }
 0x772   : > { %2546 = vpow2.f32 %v1723_v12  ;;  %2370 = vmatpush3.msra.mxu1 %v1391_v13 }
 0x773   : > { %2379 = vmatprep.subr.mxu1 %v2727_v1 }
 0x774   : > { %v2543_v14 = vpop.eup %2542 }
 0x775   : > { %2372 = vmatmul.mubr.msk.f32.vlgmr.msra.gmra.mrb[14].mxu1 %vm425_vm2, %v2543_v14  ;;  %v1383_v20 = vsel %vm425_vm2, %v2543_v14, 0.0  ;;  %v1906_v25 = vpop.permute.xlu0 %1905  ;;  %v2214_v14 = vld [vmem:[%s3256_s5] ss:$0 sm:$0xff] }
 0x776   : > { %2380 = vmatpush3.msra.mxu1 %v1560_v15  ;;  %2381 = vmatprep.mubr.msk.f32.mxu1 %vm2726_vm0, %v2727_v1 }
 0x777   : > { %2389 = vmatprep.subr.mxu1 %v2727_v1 }
 0x778   : > { %v2545_v16 = vpop.eup %2544 }
 0x779   : > { %2382 = vmatmul.mubr.msk.f32.vlgmr.msra.gmra.mrb[16].mxu1 %vm425_vm2, %v2545_v16  ;;  %v1552_v17 = vsel %vm425_vm2, %v2545_v16, 0.0  ;;  %v2215_v16 = vld [vmem:[%s3257_s6] ss:$0 sm:$0xff] }
 0x77a   : > { %1553 = vadd.xlane.f32.xlu1 %v1552_v17  ;;  %2391 = vmatprep.mubr.msk.f32.mxu1 %vm2726_vm0, %v2727_v1 }
 0x77c   : > { %v2547_v18 = vpop.eup %2546 }
 0x77d   : > { %v1725_v19 = vsel %vm425_vm2, %v2547_v18, 0.0 }
 0x77e   : > { %1726 = vadd.xlane.f32.xlu0 %v1725_v19  ;;  %1384 = vadd.xlane.f32.xlu1 %v1383_v20 }
 0x79a   : > { %v1894_v21 = vpop.xlane.xlu1 %1893 }
 0x79b   : > { %v1895_v22 = vsub.f32 %v1888_v0, %v1894_v21 }
 0x79d   : > { %v1896_v23 = vmul.f32 1.442695, %v1895_v22 }
 0x79e   : > { %v1733_v24 = vpop.permute.xlu1 %1732 }
 0x79f   : > { %2548 = vpow2.f32 %v1896_v23  ;;  %2390 = vmatpush3.msra.mxu1 %v1733_v24 }
 0x7a0   : > { %2392 = vmatmul.mubr.msk.f32.vlgmr.msra.gmra.mrb[18].mxu1 %vm425_vm2, %v2547_v18  ;;  %2399 = vmatprep.subr.mxu1 %v2727_v1 }
 0x7a1   : > { %2400 = vmatpush3.msra.mxu1 %v1906_v25  ;;  %2401 = vmatprep.mubr.msk.f32.mxu1 %vm2726_vm0, %v2727_v1 }
 0x7a9   : > { %v2549_v26 = vpop.eup %2548 }
 0x7aa   : > { %2402 = vmatmul.mubr.msk.f32.vlgmr.msra.gmra.mrb[20].mxu1 %vm425_vm2, %v2549_v26  ;;  %v1898_v27 = vsel %vm425_vm2, %v2549_v26, 0.0 }
 0x7ab   : > { %1899 = vadd.xlane.f32.xlu0 %v1898_v27 }
 0x807   : > { %v1554_v28 = vpop.xlane.xlu1 %1553 }
 0x80b   : > { %v1385_v29 = vpop.xlane.xlu1 %1384  ;;  %v1727_v42 = vpop.xlane.xlu0 %1726 }
 0x80c   : > { %2550 = vrcp.f32 %v1385_v29 }
 0x80d   : > { %2552 = vrcp.f32 %v1554_v28 }
 0x80e   : > { %2554 = vrcp.f32 %v1727_v42 }
 0x816   : > { %v2551_v30 = vpop.eup %2550 }
 0x817   : > { %v1387_v31 = vmul.f32 %v2551_v30, %v1385_v29  ;;  %v2553_v32 = vpop.eup %2552 }
 0x818   : > { %v1556_v33 = vmul.f32 %v2553_v32, %v1554_v28  ;;  %v2555_v46 = vpop.eup %2554 }
 0x819   : > { %v1388_v34 = vsub.f32 2.0, %v1387_v31  ;;  %v1729_v48 = vmul.f32 %v2555_v46, %v1727_v42 }
 0x81a   : > { %v1557_v35 = vsub.f32 2.0, %v1556_v33 }
 0x81b   : > { %v1389_v36 = vmul.f32 %v2551_v30, %v1388_v34  ;;  %v1730_v51 = vsub.f32 2.0, %v1729_v48 }
 0x81c   : > { %v1558_v39 = vmul.f32 %v2553_v32, %v1557_v35 }
 0x81d   : > { %v1731_v53 = vmul.f32 %v2555_v46, %v1730_v51 }
 0x838   : > { %v1900_v44 = vpop.xlane.xlu0 %1899 }
 0x839   : > { %2556 = vrcp.f32 %v1900_v44 }
 0x843   : > { %v2557_v52 = vpop.eup %2556 }
 0x844   : > { %v1902_v55 = vmul.f32 %v2557_v52, %v1900_v44 }
 0x846   : > { %v1903_v58 = vsub.f32 2.0, %v1902_v55 }
 0x848   : > { %v1462_v37 = vpop.f32.mrb[14].mxu1  ;;  %v1904_v60 = vmul.f32 %v2557_v52, %v1903_v58 }
 0x849   : > { %v1466_v38 = vmul.f32 %v1462_v37, %v1389_v36  ;;  %v2373_v1 = vpop.f32.mrb[15].mxu1 }
 0x84b   : > { %1467 = vst.msk [vmem:[#allocation2] sm:$0xff] %vm425_vm2, %v1466_v38 }
 0x84c   : > { %v1631_v9 = vpop.f32.mrb[16].mxu1 }
 0x84d   : > { %v1635_v40 = vmul.f32 %v1631_v9, %v1558_v39  ;;  %v2383_v41 = vpop.f32.mrb[17].mxu1 }
 0x84f   : > { %1637 = vrot.lane.b32.xlu0 %v1635_v40, %s2739_s13 }
 0x86e   : > { %1196 = vadd.xlane.f32.xlu0 %v1195_v49 }
 0x873   : > { %v1804_v54 = vpop.f32.mrb[18].mxu1 }
 0x874   : > { %v1808_v56 = vmul.f32 %v1804_v54, %v1731_v53  ;;  %v2393_v57 = vpop.f32.mrb[19].mxu1 }
 0x876   : > { %1810 = vrot.lane.b32.xlu1 %v1808_v56, %s2740_s22  ;;  %s2648_s22 = scalar_lea.vmem %s3205_s30, 256 }
 0x877   : > { %p2649_p11 = scmp.ne.s32.totalorder %s3205_s30, %s2648_s22  ;;  %p2656_p9 = scmp.lt.s32.totalorder %s2654_s19, %s2648_s22 }
 0x879   : > { %p2650_p2 = pnand %p2649_p11, %p3278_p0  ;;  %p2657_p12 = por %p2656_p9, %p2655_p7 }
 0x87b   : > { %p2651_p3 = pneg %p2650_p2 }
 0x87d   : > { %v1977_v50 = vpop.f32.mrb[20].mxu1  ;;  %p2658_p1 = pnand %p2657_p12, %p2651_p3 }
 0x87e   : > { %v1981_v61 = vmul.f32 %v1977_v50, %v1904_v60  ;;  %v2403_v0 = vpop.f32.mrb[21].mxu1 }
 0x880   : > { %1983 = vrot.lane.b32.xlu1 %v1981_v61, %s2741_s9 }
 0x8c1   : > { %v1638_v8 = vpop.permute.xlu0 %1637 }
 0x8c2   : > { %1640 = vst.msk [vmem:[#allocation2] sm:$0xff] %vm764_vm3, %v1638_v8 }
 0x8e8   : > { %v1811_v62 = vpop.permute.xlu1 %1810 }
 0x8e9   : > { %1813 = vst.msk [vmem:[#allocation2] sm:$0xff] %vm938_vm4, %v1811_v62 }
 0x8f2   : > { %v1984_v63 = vpop.permute.xlu1 %1983 }
 0x8f3   : > { %1986 = vst.msk [vmem:[#allocation2] sm:$0xff] %vm1112_vm5, %v1984_v63 }
 0x8fa   : > { %v1987_v2 = vld [vmem:[#allocation2] sm:$0xff] }
 0x8fb   : > { %v1197_v3 = vpop.xlane.xlu0 %1196  ;;  %2413 = vmatmul.mubr.msk.f32.vlgmr.msra.gmra.mrb[16].mxu0 %vm347_vm1, %v1987_v2 }
 0x8fc   : > { %v1198_v4 = vmul.f32 0.03125, %v1197_v3 }
 0x8fe   : > { %v1199_v5 = vsub.f32 %v1194_v47, %v1198_v4 }
 0x900   : > { %v1200_v6 = vmul.f32 %v1199_v5, %v1199_v5 }
 0x902   : > { %v1201_v7 = vsel %vm347_vm1, %v1200_v6, 0.0 }
 0x903   : > { %1202 = vadd.xlane.f32.xlu0 %v1201_v7 }
 0x990   : > { %v1203_v10 = vpop.xlane.xlu0 %1202 }
 0x991   : > { %v1204_v11 = vmul.f32 0.03125, %v1203_v10 }
 0x993   : > { %v1205_v12 = vadd.f32 1e-05, %v1204_v11 }
 0x995   : > { %2558 = vrsqrt.f32 %v1205_v12 }
 0x99f   : > { %v2559_v13 = vpop.eup %2558 }
 0x9a0   : > { %v1207_v15 = vmul.f32 %v2559_v13, %v1199_v5 }
 0x9a2   : > { %v1214_v17 = vmul.f32 %v2214_v14, %v1207_v15 }
 0x9a4   : > { %v1221_v18 = vadd.f32 %v2215_v16, %v1214_v17 }
 0x9a6   : > { %1222 = vst.msk [vmem:[%s325_s23] sm:$0xff] %vm347_vm1, %v1221_v18 }
 0x9ce   : > { %v2057_v19 = vpop.f32.mrb[16].mxu0 }
 0x9cf   : > { %v2058_v20 = vadd.f32 %v2212_v43, %v2057_v19  ;;  %v2414_v21 = vpop.f32.mrb[17].mxu0 }
 0x9d1   : > { %v2061_v22 = vadd.f32 %v3078_v59, %v2058_v20 }
 0x9d3   : > { %v2062_v23 = vsel %vm347_vm1, %v2061_v22, 0.0 }
 0x9d4   : > { %2063 = vadd.xlane.f32.xlu1 %v2062_v23 }
 0xa61   : > { %v2064_v24 = vpop.xlane.xlu1 %2063 }
 0xa62   : > { %v2065_v25 = vmul.f32 0.03125, %v2064_v24 }
 0xa64   : > { %v2066_v26 = vsub.f32 %v2061_v22, %v2065_v25 }
 0xa66   : > { %v2067_v27 = vmul.f32 %v2066_v26, %v2066_v26 }
 0xa68   : > { %v2068_v28 = vsel %vm347_vm1, %v2067_v27, 0.0 }
 0xa69   : > { %2069 = vadd.xlane.f32.xlu0 %v2068_v28 }
 0xaf6   : > { %v2070_v29 = vpop.xlane.xlu0 %2069 }
 0xaf7   : > { %v2071_v30 = vmul.f32 0.03125, %v2070_v29 }
 0xaf9   : > { %v2072_v31 = vadd.f32 1e-05, %v2071_v30 }
 0xafb   : > { %2560 = vrsqrt.f32 %v2072_v31 }
 0xb05   : > { %v2561_v32 = vpop.eup %2560 }
 0xb06   : > { %v2074_v33 = vmul.f32 %v2561_v32, %v2066_v26 }
 0xb08   : > { %v2075_v59 = vmul.f32 %v2214_v14, %v2074_v33 }
 0xb0a   : > { %v2076_v34 = vadd.f32 %v2215_v16, %v2075_v59 }
 0xb0c   : > { %2231 = vst.msk [vmem:[%s325_s23 + $0x8] sm:$0xff] %vm347_vm1, %v2076_v34 }
 0xb0d   : > { %2661 = shalt.err (!%p2658_p1)
}
 0xb0e   : > { %s2662_s14 = scalar_lea.hbm %s3203_s29, 256  ;;  %s2666_s18 = scalar_lea.hbm %s3258_s7, 512 }
 0xb0f   : > { %p2663_p13 = scmp.ne.s32.totalorder %s3203_s29, %s2662_s14  ;;  %p2667_p4 = scmp.lt.u32.totalorder %s3203_s29, %s3258_s7 }
 0xb10   : > { %p2668_p5 = scmp.lt.u32.totalorder %s2666_s18, %s2662_s14  ;;  %p2670_p11 = scmp.lt.u32.totalorder %s2662_s14, %s3203_s29 }
 0xb11   : > { %p2664_p6 = pnand %p2663_p13, %p3278_p0 }
 0xb12   : > { %p2669_p8 = por %p2668_p5, %p2667_p4 }
 0xb13   : > { %p2665_p10 = pneg %p2664_p6 }
 0xb14   : > { %p2671_p2 = por %p2670_p11, %p2669_p8 }
 0xb16   : > { %p2672_p3 = pnand %p2671_p2, %p2665_p10 }
 0xb18   : > { %2675 = shalt.err (!%p2672_p3)
}
 0xb19   : > { %s2743_s22 = smov 128  }
 0xb1a   : > { %2449 = dma.vmem_to_hbm [thread:$0]  (%p3278_p0), %s3205_s30, 256, %s3203_s29, %s2080_s10, %s2743_s22, %s2743_s22, %s2739_s13  }
 0xb1b PF: > { %s2108_s28 = sand.u32 1, %s2706_s24   ;;  %p3279_p7 = scmp.ne.s32.totalorder %s3266_s8, 0 }
 0xb1c   : > { %p3280_p9 = scmp.ge.s32.totalorder %s2718_s27, 2  ;;  %s2109_s15 = scalar_lea.sflag [#allocation5], %s2108_s28 }
 0xb1e   : > { %p2463_p12 = pnand %p3280_p9, %p3279_p7 }
 0xb20   : > { %2701 = dma.done.wait (!%p2463_p12), %s2109_s15, 256  }
 0xb21   : > { %2703 = vsyncadd (!%p2463_p12), %s2109_s15, 4294967040  ;;  %p21_p1 = scmp.ge.s32.totalorder %s2900_s12, 4   ;;  %s3281_s24 = smov %s2710_s25 }
 0xb22   : > { %s3282_s25 = smov %s2714_s26  ;;  %s3283_s26 = smov %s2916_s17 }
 0xb23   : > { %s3284_s27 = smov %s2900_s12  ;;  %23 = sbr.rel (!%p21_p1) target bundleno = 6 (0x6), region = 103 }
 0xb2a   :  { %2114 = vsyncpa [#allocation4], 1 }
 0xb2b   :  { %2116 = vsyncpa [#allocation4 + $0x1], 1 }
 0xb2c   :  { %2117 = vsyncpa [#allocation7], 1 }
 0xb2d   :  { %2118 = vsyncpa [#allocation5], 1 }
 0xb2e   :  { %2120 = vsyncpa [#allocation5 + $0x1], 1 }

</bundles_post_ra>
